<compile_context>
chip_gen: v6e
topology: v6e:2x2x1
jax: 0.10.0
libtpu: 0.0.40
codegen_flags: <defaults>
</compile_context>

<pallas_src>
import functools

import numpy as np

import jax
import jax.numpy as jnp
from jax import lax
from jax.experimental import pallas as pl
from jax.experimental.pallas import tpu as pltpu


# ---------------------------------------------------------------------------
# Kernel: one (C, ts) tile of pixels of one image.  Weights stay resident in
# VMEM across the whole grid; compute is sub-tiled along the lane axis.
# ---------------------------------------------------------------------------
def _ffn_kernel(x_ref, w1_ref, b1_ref, w2_ref, b2_ref, o_ref, *, chunk):
    # x_ref:  (C,  ts)   tile of one image's pixels (channels x spatial)
    # w1_ref: (3C, C)    bf16 first  1x1-conv weight (PyTorch layout, squeezed)
    # b1_ref: (3C, 1)    f32
    # w2_ref: (C,  3C)   bf16 second 1x1-conv weight
    # b2_ref: (C,  1)    f32
    # o_ref:  (C,  ts)
    w1 = w1_ref[...]
    b1 = b1_ref[...]
    w2 = w2_ref[...]
    b2 = b2_ref[...]
    n_chunks = x_ref.shape[-1] // chunk   # chunk divides ts (ensured in Python)

    def body(i, carry):
        s = pl.multiple_of(i * chunk, chunk)
        x = x_ref[:, pl.ds(s, chunk)].astype(jnp.bfloat16)
        h = jnp.dot(w1, x, preferred_element_type=jnp.float32)
        h = jnp.maximum(h + b1, 0.0)                          # ReLU
        # TODO(synk): Dropout2d(p=0.1) is identity in eval mode; training-mode
        # channel dropout (per-(N,C) mask + 1/(1-p) scale via pltpu.prng_*) is
        # intentionally not applied here.
        y = jnp.dot(w2, h.astype(jnp.bfloat16),
                    preferred_element_type=jnp.float32)
        o_ref[:, pl.ds(s, chunk)] = (y + b2).astype(o_ref.dtype)
        return carry

    lax.fori_loop(0, n_chunks, body, 0, unroll=True)


# ---------------------------------------------------------------------------
# Generation gating / tile selection (all static, done in Python).
# ---------------------------------------------------------------------------
@functools.lru_cache(maxsize=None)
def _chip_config():
    """Returns (max_spatial_tile, vmem_limit_bytes, num_tensorcores)."""
    vmem_bytes = None
    try:
        vmem_bytes = int(pltpu.get_tpu_info().vmem_capacity_bytes)
    except Exception:
        vmem_bytes = None
    try:
        kind = jax.devices()[0].device_kind.lower()
    except Exception:
        kind = ""
    is_v7 = ("v7" in kind) or (vmem_bytes is not None and vmem_bytes <= 80 * 2**20)
    if is_v7:
        # v7x: 64 MiB VMEM per TC, 2 TCs -> keep headroom, balance the grid.
        return 4096, 48 * 2**20, 2
    if vmem_bytes is None and not kind:
        # Unknown target (e.g. emulation): stay conservative.
        return 4096, 48 * 2**20, 1
    # v5e / v6e: 128 MiB VMEM, 1 TC -> large tiles amortize per-step overhead.
    return 8192, 64 * 2**20, 1


def _pick_spatial_tile(hw, c, in_itemsize, out_itemsize,
                       max_ts, vmem_limit, num_tc, n_batch):
    """Lane (spatial) tile: multiple of 128 (or full extent), as large as the
    VMEM budget allows, with near-equal tiles when the spatial axis is split."""
    # Double-buffered input + output blocks should use at most ~half the VMEM
    # budget (the rest covers resident weights + the chunked intermediates).
    bytes_per_col = 2 * c * (in_itemsize + out_itemsize)
    cap_cols = (vmem_limit // 2) // max(bytes_per_col, 1)
    cap_cols = max(128, (cap_cols // 128) * 128)
    max_ts = min(max_ts, cap_cols)

    if hw <= max_ts:
        ts, n_s = hw, 1
    else:
        k = pl.cdiv(hw, max_ts)               # number of spatial programs
        ts = 128 * pl.cdiv(hw, 128 * k)       # near-equal, multiple of 128
        n_s = pl.cdiv(hw, ts)

    # Only split a single-program grid when the chip has 2 TensorCores (v7x);
    # on single-TC v5e/v6e the grid is a serial loop and splitting just adds
    # per-step overhead.
    if num_tc >= 2 and n_batch * n_s < 2 and hw >= 256:
        ts = 128 * pl.cdiv(hw, 256)
        n_s = pl.cdiv(hw, ts)
    return ts, n_s


def _pick_chunk(ts):
    """Lane sub-tile for the in-kernel compute loop (keeps the 3C x chunk
    f32/bf16 intermediates small so the DMA-facing tile `ts` can grow)."""
    for cand in (1024, 512, 256, 128):
        if ts % cand == 0:
            return cand
    return ts


def prepare_ffn_params(w1, b1, w2, b2):
    """Cast weights to bf16 / biases to f32 column vectors once.  Weights are
    static across calls, so hoist this out of the per-call path and reuse."""
    c3, c = w1.shape
    return (jnp.asarray(w1, jnp.bfloat16),
            jnp.asarray(b1, jnp.float32).reshape(c3, 1),
            jnp.asarray(w2, jnp.bfloat16),
            jnp.asarray(b2, jnp.float32).reshape(c, 1))


# ---------------------------------------------------------------------------
# pallas_call wrapper.
# ---------------------------------------------------------------------------
@functools.partial(
    jax.jit, static_argnames=("ts", "n_s", "chunk", "vmem_limit", "out_dtype"))
def _ffn_pallas(x3d, w1_bf, b1_col, w2_bf, b2_col, *,
                ts, n_s, chunk, vmem_limit, out_dtype):
    n, c, hw = x3d.shape
    c3 = w1_bf.shape[0]

    m = n * hw
    cost = pl.CostEstimate(
        flops=4 * m * c * c3,                               # two matmuls/pixel
        transcendentals=0,
        bytes_accessed=(m * c * (x3d.dtype.itemsize + np.dtype(out_dtype).itemsize)
                        + 2 * c3 * c * 2 + (c3 + c) * 4),
    )

    return pl.pallas_call(
        functools.partial(_ffn_kernel, chunk=chunk),
        out_shape=jax.ShapeDtypeStruct((n, c, hw), out_dtype),
        grid_spec=pltpu.PrefetchScalarGridSpec(
            num_scalar_prefetch=0,
            grid=(n, n_s),
            in_specs=[
                pl.BlockSpec((None, c, ts), lambda b, s: (b, 0, s)),  # x tile
                pl.BlockSpec((c3, c), lambda b, s: (0, 0)),           # w1
                pl.BlockSpec((c3, 1), lambda b, s: (0, 0)),           # b1
                pl.BlockSpec((c, c3), lambda b, s: (0, 0)),           # w2
                pl.BlockSpec((c, 1), lambda b, s: (0, 0)),            # b2
            ],
            out_specs=pl.BlockSpec((None, c, ts), lambda b, s: (b, 0, s)),
        ),
        compiler_params=pltpu.CompilerParams(
            dimension_semantics=("parallel", "parallel"),
            vmem_limit_bytes=vmem_limit,
        ),
        cost_estimate=cost,
    )(x3d, w1_bf, b1_col, w2_bf, b2_col)


def feedforward_network(x_nchw, w1, b1, w2, b2, *, out_dtype=None):
    """x_nchw: (N, C, H, W).  w1: (3C, C), w2: (C, 3C) (1x1-conv weights with
    the kernel dims squeezed); biases of shape (3C,)/(C,) or the prepared
    (., 1) column form.  Returns (N, C, H, W) in `out_dtype` (defaults to x's
    dtype; pass jnp.bfloat16 to cut HBM write traffic)."""
    n, c, h, w = x_nchw.shape
    c3 = w1.shape[0]
    assert w1.shape == (c3, c) and w2.shape == (c, c3)
    assert b1.reshape(-1).shape == (c3,) and b2.reshape(-1).shape == (c,)

    out_dtype = np.dtype(x_nchw.dtype if out_dtype is None else out_dtype)
    max_ts, vmem_limit, num_tc = _chip_config()

    hw = h * w
    ts, n_s = _pick_spatial_tile(hw, c, x_nchw.dtype.itemsize,
                                 out_dtype.itemsize, max_ts, vmem_limit,
                                 num_tc, n)
    chunk = _pick_chunk(ts)

    # No-op if the params were already prepared via prepare_ffn_params().
    w1_bf, b1_col, w2_bf, b2_col = prepare_ffn_params(w1, b1, w2, b2)
    x3d = x_nchw.reshape(n, c, hw)          # free reshape: NCHW is contiguous

    out3d = _ffn_pallas(x3d, w1_bf, b1_col, w2_bf, b2_col,
                        ts=ts, n_s=n_s, chunk=chunk,
                        vmem_limit=vmem_limit, out_dtype=out_dtype)
    return out3d.reshape(n, c, h, w)


# ---------------------------------------------------------------------------
# Demo / self-check.
# ---------------------------------------------------------------------------
def _init_params(key, channels):
    """Deterministic synthetic init matching the module's parameter shapes.

    Conv2d(C, 3C, k=1) weight (3C, C, 1, 1) -> (3C, C);
    Conv2d(3C, C, k=1) weight (C, 3C, 1, 1) -> (C, 3C).
    """
    c3 = 3 * channels
    k1, k2, k3, k4 = jax.random.split(key, 4)
    s1 = 1.0 / jnp.sqrt(channels)
    s2 = 1.0 / jnp.sqrt(c3)
    w1 = jax.random.uniform(k1, (c3, channels), jnp.float32, -s1, s1)
    b1 = jax.random.uniform(k2, (c3,), jnp.float32, -s1, s1)
    w2 = jax.random.uniform(k3, (channels, c3), jnp.float32, -s2, s2)
    b2 = jax.random.uniform(k4, (channels,), jnp.float32, -s2, s2)
    return w1, b1, w2, b2


def _reference(x_nchw, w1, b1, w2, b2):
    """Pure-JAX f32 reference for the same math (eval-mode dropout)."""
    n, c, h, w = x_nchw.shape
    xm = x_nchw.reshape(n, c, h * w)
    hmid = jnp.maximum(jnp.einsum("oc,ncs->nos", w1, xm) + b1[None, :, None], 0.0)
    y = jnp.einsum("co,nos->ncs", w2, hmid) + b2[None, :, None]
    return y.reshape(n, c, h, w)


if __name__ == "__main__":
    channels = 128          # module default
    N, H, W = 2, 16, 16     # small demo shape -> 256 pixels per image
    key = jax.random.PRNGKey(0)
    kx, kp = jax.random.split(key)

    x = jax.random.normal(kx, (N, channels, H, W), jnp.float32)
    w1, b1, w2, b2 = _init_params(kp, channels)

    # Weights are static: cast/reshape them once and reuse across calls.
    params = prepare_ffn_params(w1, b1, w2, b2)

    out = feedforward_network(x, *params)
    out = jax.block_until_ready(out)

    ref = _reference(x, w1, b1, w2, b2)
    assert out.shape == (N, channels, H, W)
    assert out.dtype == x.dtype
    # bf16 matmul inputs with f32 accumulation -> looser tolerance than f32.
    assert jnp.allclose(out, ref, atol=3e-2, rtol=3e-2), (
        float(jnp.max(jnp.abs(out - ref))))

    print("KERNEL_OK")
</pallas_src>

<mosaic_0001>
module attributes {stable_mosaic.version = 11 : i64} {
  func.func @_ffn_kernel(%arg0: i32, %arg1: i32, %arg2: memref<1x128x256xf32, #tpu.memory_space<vmem>>, %arg3: memref<384x128xbf16, #tpu.memory_space<vmem>>, %arg4: memref<384x1xf32, #tpu.memory_space<vmem>>, %arg5: memref<128x384xbf16, #tpu.memory_space<vmem>>, %arg6: memref<128x1xf32, #tpu.memory_space<vmem>>, %arg7: memref<1x128x256xf32, #tpu.memory_space<vmem>>) attributes {dimension_semantics = [#tpu.dimension_semantics<parallel>, #tpu.dimension_semantics<parallel>], iteration_bounds = array<i64: 2, 1>, scalar_prefetch = 0 : i64, scratch_operands = 0 : i64, tpu.core_type = #tpu.core_type<tc>, window_params = [{transform_indices = @transform_0, window_bounds = array<i64: 1, 128, 256>}, {pipeline_mode = #tpu.pipeline_mode<synchronous>, transform_indices = @transform_1, window_bounds = array<i64: 384, 128>}, {pipeline_mode = #tpu.pipeline_mode<synchronous>, transform_indices = @transform_2, window_bounds = array<i64: 384, 1>}, {pipeline_mode = #tpu.pipeline_mode<synchronous>, transform_indices = @transform_3, window_bounds = array<i64: 128, 384>}, {pipeline_mode = #tpu.pipeline_mode<synchronous>, transform_indices = @transform_4, window_bounds = array<i64: 128, 1>}, {transform_indices = @transform_5, window_bounds = array<i64: 1, 128, 256>}]} {
    %c0 = arith.constant 0 : index
    %c0_0 = arith.constant 0 : index
    %0 = vector.load %arg3[%c0, %c0_0] : memref<384x128xbf16, #tpu.memory_space<vmem>>, vector<384x128xbf16>
    %c0_1 = arith.constant 0 : index
    %c0_2 = arith.constant 0 : index
    %1 = vector.load %arg4[%c0_1, %c0_2] : memref<384x1xf32, #tpu.memory_space<vmem>>, vector<384x1xf32>
    %c0_3 = arith.constant 0 : index
    %c0_4 = arith.constant 0 : index
    %2 = vector.load %arg5[%c0_3, %c0_4] : memref<128x384xbf16, #tpu.memory_space<vmem>>, vector<128x384xbf16>
    %c0_5 = arith.constant 0 : index
    %c0_6 = arith.constant 0 : index
    %3 = vector.load %arg6[%c0_5, %c0_6] : memref<128x1xf32, #tpu.memory_space<vmem>>, vector<128x1xf32>
    %c0_i32 = arith.constant 0 : i32
    %c256_i32 = arith.constant 256 : i32
    %4 = arith.muli %c0_i32, %c256_i32 : i32
    %5 = tpu.assume_multiple %4, 256 : i32
    %c0_7 = arith.constant 0 : index
    %c0_8 = arith.constant 0 : index
    %6 = arith.index_cast %5 : i32 to index
    %7 = vector.load %arg2[%c0_7, %c0_8, %6] : memref<1x128x256xf32, #tpu.memory_space<vmem>>, vector<1x128x256xf32>
    %8 = vector.shape_cast %7 : vector<1x128x256xf32> to vector<128x256xf32>
    %9 = arith.truncf %8 : vector<128x256xf32> to vector<128x256xbf16>
    %cst = arith.constant dense<0.000000e+00> : vector<384x256xf32>
    %10 = tpu.matmul %0, %9, %cst {dimension_numbers = #tpu.dot_dimension_numbers<[1], [0], [0], [1], [0, 0, 1, 1], [], []>} : vector<384x128xbf16>, vector<128x256xbf16>, vector<384x256xf32> -> vector<384x256xf32>
    %11 = vector.broadcast %1 : vector<384x1xf32> to vector<384x256xf32>
    %12 = arith.addf %10, %11 : vector<384x256xf32>
    %cst_9 = arith.constant 0.000000e+00 : f32
    %13 = vector.broadcast %cst_9 : f32 to vector<384x256xf32>
    %14 = arith.maximumf %12, %13 : vector<384x256xf32>
    %15 = arith.truncf %14 : vector<384x256xf32> to vector<384x256xbf16>
    %cst_10 = arith.constant dense<0.000000e+00> : vector<128x256xf32>
    %16 = tpu.matmul %2, %15, %cst_10 {dimension_numbers = #tpu.dot_dimension_numbers<[1], [0], [0], [1], [0, 0, 1, 1], [], []>} : vector<128x384xbf16>, vector<384x256xbf16>, vector<128x256xf32> -> vector<128x256xf32>
    %17 = vector.broadcast %3 : vector<128x1xf32> to vector<128x256xf32>
    %18 = arith.addf %16, %17 : vector<128x256xf32>
    %c0_11 = arith.constant 0 : index
    %c0_12 = arith.constant 0 : index
    %19 = arith.index_cast %5 : i32 to index
    %20 = vector.load %arg7[%c0_11, %c0_12, %19] : memref<1x128x256xf32, #tpu.memory_space<vmem>>, vector<1x128x256xf32>
    %21 = vector.shape_cast %20 : vector<1x128x256xf32> to vector<128x256xf32>
    %22 = vector.shape_cast %18 : vector<128x256xf32> to vector<1x128x256xf32>
    tpu.vector_store %arg7[%c0_11, %c0_12, %19], %22 {strides = array<i32>} : memref<1x128x256xf32, #tpu.memory_space<vmem>>, vector<1x128x256xf32>,
    %c1_i32 = arith.constant 1 : i32
    return
  }
  func.func @transform_0(%arg0: i32, %arg1: i32) -> (i32, i32, i32) {
    %c0_i32 = arith.constant 0 : i32
    %c0_i32_0 = arith.constant 0 : i32
    return %arg0, %c0_i32, %arg1 : i32, i32, i32
  }
  func.func @transform_1(%arg0: i32, %arg1: i32) -> (i32, i32) {
    %c0_i32 = arith.constant 0 : i32
    %c0_i32_0 = arith.constant 0 : i32
    %c0_i32_1 = arith.constant 0 : i32
    return %c0_i32, %c0_i32_0 : i32, i32
  }
  func.func @transform_2(%arg0: i32, %arg1: i32) -> (i32, i32) {
    %c0_i32 = arith.constant 0 : i32
    %c0_i32_0 = arith.constant 0 : i32
    %c0_i32_1 = arith.constant 0 : i32
    return %c0_i32, %c0_i32_0 : i32, i32
  }
  func.func @transform_3(%arg0: i32, %arg1: i32) -> (i32, i32) {
    %c0_i32 = arith.constant 0 : i32
    %c0_i32_0 = arith.constant 0 : i32
    %c0_i32_1 = arith.constant 0 : i32
    return %c0_i32, %c0_i32_0 : i32, i32
  }
  func.func @transform_4(%arg0: i32, %arg1: i32) -> (i32, i32) {
    %c0_i32 = arith.constant 0 : i32
    %c0_i32_0 = arith.constant 0 : i32
    %c0_i32_1 = arith.constant 0 : i32
    return %c0_i32, %c0_i32_0 : i32, i32
  }
  func.func @transform_5(%arg0: i32, %arg1: i32) -> (i32, i32, i32) {
    %c0_i32 = arith.constant 0 : i32
    %c0_i32_0 = arith.constant 0 : i32
    return %arg0, %c0_i32, %arg1 : i32, i32, i32
  }
}

</mosaic_0001>

<bundles_post_ra>
// kernel: _ffn_pallas.1
= control target key start
LH: loop header
LB: loop body
LE: loop exit
PB: predicated region body
PF: predicated region fallthrough
CT: control target
= control target key end

     0   :  { %10 = vsyncpa [#allocation3], 0  ;;  %s3056_s0 = inlined_call_operand.vmem [shape: f32[2,128,256], index: 0, kind: input, shape index: {}]   ;;  %s3057_s1 = inlined_call_operand.hbm [shape: bf16[384,128], index: 1, kind: input, shape index: {}]   ;;  %s3058_s2 = inlined_call_operand.vmem [shape: f32[384,1], index: 2, kind: input, shape index: {}]   ;;  %s3059_s3 = inlined_call_operand.hbm [shape: bf16[128,384], index: 3, kind: input, shape index: {}]   ;;  %s3060_s4 = inlined_call_operand.vmem [shape: f32[128,1], index: 4, kind: input, shape index: {}]   ;;  %s3061_s5 = inlined_call_operand.hbm [shape: f32[2,128,256], index: 5, kind: output, shape index: {}]  }
   0x1   :  { %11 = vsyncpa [#allocation6], 0 }
   0x2   :  { %12 = vsyncpa [#allocation4], 0 }
   0x3   :  { %14 = vsyncpa [#allocation4 + $0x1], 0  ;;  %s2247_s18 = smov 0   ;;  %s2249_s19 = smov 0  }
   0x4   :  { %s2251_s20 = smov 0   ;;  %s2253_s21 = smov 0  }
   0x5   :  { %s2255_s22 = smov 0   ;;  %s2257_s23 = smov 0  }
   0x6 LB: > { %s1861_s24 = sadd.s32 4294967295, %s2205_s23   ;;  %s1862_s25 = sadd.s32 4294967294, %s2205_s23   ;;  %s2205_s23 = sphi %s2257_s23, %s20_s23   ;;  %s2201_s22 = sphi %s2255_s22, %s3095_s22   ;;  %s2197_s21 = sphi %s2253_s21, %s3094_s21   ;;  %s2193_s20 = sphi %s2251_s20, %s3093_s20   ;;  %s2189_s19 = sphi %s2249_s19, %s3092_s19   ;;  %s2185_s18 = sphi %s2247_s18, %s3091_s18  }
   0x7   : > { %s32_s26 = sadd.s32 1, %s2201_s22  ;;  %s153_s27 = sadd.s32 1, %s2193_s20 }
   0x8   : > { %p34_p0 = scmp.ge.s32.totalorder %s32_s26, 2  ;;  %p163_p1 = scmp.ne.s32.totalorder %s2193_s20, %s2189_s19 }
   0x9   : > { %p164_p2 = scmp.eq.s32.totalorder %s1861_s24, 1  ;;  %p169_p3 = scmp.ne.s32.totalorder %s2189_s19, %s2185_s18 }
   0xa   : > { %s3097_s26 = smov (%p34_p0, %s32_s26), 0  ;;  %p170_p5 = scmp.eq.s32.totalorder %s1862_s25, 1 }
   0xb   : > { %p2287_p4 = por %p164_p2, %p163_p1  ;;  %s148_s29 = ssub.s32 %s2201_s22, %s3097_s26 }
   0xc   : > { %p1863_p6 = scmp.ge.s32.totalorder %s2205_s23, 1  ;;  %p151_p7 = scmp.eq.s32.totalorder %s148_s29, 0 }
   0xd   : > { %s3071_s28 = scalar_select %p2287_p4, 1, 0 }
   0xe   : > { %p2294_p8 = por %p170_p5, %p169_p3  ;;  %p177_p9 = scmp.lt.s32.totalorder %s2205_s23, 3 }
   0xf   : > { %s2300_s6 = scalar_select %p151_p7, %s2193_s20, %s153_s27  }
  0x10   : > { %s3072_s30 = scalar_select %p2294_p8, 1, 0 }
  0x11   : > { %p2302_p10 = pnand %p1863_p6, %p177_p9  ;;  %p2306_p11 = scmp.eq.s32.totalorder %s1861_s24, 0 }
  0x12   : > { %s2207_s9 = smov [#allocation2]   ;;  %s2208_s12 = smov [#allocation5]  }
  0x13   : > { %p1938_p12 = pneg %p2302_p10  ;;  %s189_s10 = sshll.u32 %s2207_s9, 4  ;;  %s190_s10 = int_to_ptr.vmem [resolvable:$true] %s189_s10 }
  0x14   : > { %s205_s13 = sshll.u32 %s2208_s12, 4  ;;  %s2080_s14 = scalar_lea.vmem %s190_s10, 3072  ;;  %s206_s13 = int_to_ptr.vmem [resolvable:$true] %s205_s13 }
  0x15   : > { %p2314_p13 = pnand %p2306_p11, %p1938_p12  ;;  %p2081_p1 = scmp.ne.s32.totalorder %s190_s10, %s2080_s14 }
  0x16   : > { %p2088_p5 = scmp.lt.s32.totalorder %s190_s10, %s190_s10  ;;  %p2089_p6 = scmp.lt.s32.totalorder %s2080_s14, %s2080_s14 }
  0x17   : > { %p2071_p0 = pneg %p2314_p13 }
  0x18   : > { %p2090_p7 = por %p2089_p6, %p2088_p5 }
  0x19   : > { %p2083_p2 = pnand %p2081_p1, %p2071_p0 }
  0x1b   : > { %p2084_p3 = pneg %p2083_p2 }
  0x1d   : > { %p2091_p9 = pnand %p2090_p7, %p2084_p3 }
  0x1f   : > { %2094 = shalt.err (!%p2091_p9)
}
  0x20   : > { %s2209_s15 = smov 64   ;;  %s2210_s16 = smov 4  }
  0x21   : > { %1941 = dma.hbm_to_vmem [thread:$0]  (!%p2314_p13), %s3057_s1, 3072, %s190_s10, [#allocation3], %s2209_s15, %s2209_s15, %s2210_s16  }
  0x22   : > { %s2106_s25 = scalar_lea.vmem %s206_s13, 3072  ;;  %p2114_p8 = scmp.lt.s32.totalorder %s206_s13, %s206_s13 }
  0x23   : > { %p2107_p12 = scmp.ne.s32.totalorder %s206_s13, %s2106_s25  ;;  %p2115_p4 = scmp.lt.s32.totalorder %s2106_s25, %s2106_s25 }
  0x25   : > { %p2109_p1 = pnand %p2107_p12, %p2071_p0  ;;  %p2116_p5 = por %p2115_p4, %p2114_p8 }
  0x27   : > { %p2110_p2 = pneg %p2109_p1 }
  0x29   : > { %p2117_p3 = pnand %p2116_p5, %p2110_p2 }
  0x2b   : > { %2120 = shalt.err (!%p2117_p3)
}
  0x2c   : > { %s2211_s27 = smov 192   ;;  %s2212_s29 = smov 12  }
  0x2d   : > { %1944 = dma.hbm_to_vmem [thread:$0]  (!%p2314_p13), %s3059_s3, 3072, %s206_s13, [#allocation6], %s2211_s27, %s2211_s27, %s2212_s29  }
  0x2e   : > { %237 = sbr.rel (%p2302_p10) target bundleno = 787 (0x313), region = 40 }
  0x33   : > { %2172 = dma.done.wait (%p2306_p11), [#allocation3], 3072  }
  0x34   : > { %2174 = vsyncadd (%p2306_p11), [#allocation3], 4294964224 }
  0x35   : > { %2176 = dma.done.wait (%p2306_p11), [#allocation6], 3072  }
  0x36   : > { %2178 = vsyncadd (%p2306_p11), [#allocation6], 4294964224  ;;  %p274_p4 = scmp.lt.s32.totalorder %s2197_s21, 1  ;;  %v3063_v0 = vmov 0   ;;  %v347_v35 = vld [vmem:[%s3058_s2 + $0x70] sm:$0xff]  ;;  %v345_v38 = vld [vmem:[%s3058_s2 + $0x60] sm:$0xff] }
  0x37   : > { %893 = vmatprep.mubr.bf16.mxu0 %v3063_v0  ;;  %2011 = vset.pattern.permute.xlu0 %v3063_v0  ;;  %v348_v40 = vld [vmem:[%s3058_s2 + $0x78] sm:$0xff]  ;;  %v346_v41 = vld [vmem:[%s3058_s2 + $0x68] sm:$0xff]  ;;  %v343_v48 = vld [vmem:[%s3058_s2 + $0x50] sm:$0xff]  ;;  %s270_s9 = sand.u32 1, %s2189_s19   ;;  %p3089_p10 = scmp.ne.s32.totalorder %s3071_s28, 0 }
  0x38   : > { %s275_s7 = scalar_select %p274_p4, %s2197_s21, 1  ;;  %2012 = vset.pattern.permute.xlu1 %v3063_v0  ;;  %549 = vperm.xlu0 %2011, %v347_v35   ;;  %v344_v49 = vld [vmem:[%s3058_s2 + $0x58] sm:$0xff]  ;;  %v341_v54 = vld [vmem:[%s3058_s2 + $0x40] sm:$0xff]  ;;  %v342_v55 = vld [vmem:[%s3058_s2 + $0x48] sm:$0xff] }
  0x39   : > { %539 = vperm.xlu1 %2012, %v345_v38   ;;  %v339_v57 = vld [vmem:[%s3058_s2 + $0x30] sm:$0xff]  ;;  %v2013_v58 = vld [vmem:[#allocation2] sm:$0xff]   ;;  %v340_v59 = vld [vmem:[%s3058_s2 + $0x38] sm:$0xff]  ;;  %s1870_s12 = sshll.u32 %s270_s9, 8  ;;  %s2214_s17 = smov [#allocation7]  }
  0x3a   : > { %s1926_s10 = sshll.u32 %s275_s7, 8  ;;  %v337_v60 = vld [vmem:[%s3058_s2 + $0x20] sm:$0xff]  ;;  %v338_v61 = vld [vmem:[%s3058_s2 + $0x28] sm:$0xff]  ;;  %v335_v63 = vld [vmem:[%s3058_s2 + $0x10] sm:$0xff]  ;;  %s2943_s7 = scalar_lea.vmem [#allocation7], %s1870_s12 }
  0x3b   : > { %s2354_s14 = scalar_lea.vmem %s3056_s0, %s1926_s10  ;;  %v2014_v62 = vld [vmem:[#allocation2 + $0x8] sm:$0xff]   ;;  %v2021_v35 = vld [vmem:[#allocation2 + $0x40] sm:$0xff]   ;;  %s1927_s10 = sshll.u32 %s2197_s21, 12 }
  0x3c   : > { %v458_v1 = vld [vmem:[%s2354_s14 + $0xe8] sm:$0xff]  ;;  %v460_v2 = vld [vmem:[%s2354_s14 + $0xf8] sm:$0xff]  ;;  %v457_v3 = vld [vmem:[%s2354_s14 + $0xe0] sm:$0xff]  ;;  %554 = vperm.xlu0 %2011, %v348_v40   ;;  %s1760_s11 = sshll.u32 %s2943_s7, 4  ;;  %s3003_s15 = scalar_lea.hbm %s3061_s5, %s1927_s10  ;;  %s3005_s11 = int_to_ptr.vmem [resolvable:$true] %s1760_s11 }
  0x3d   : > { %v476_v4 = vpack.c.bf16 %v460_v2, %v458_v1  ;;  %v459_v5 = vld [vmem:[%s2354_s14 + $0xf0] sm:$0xff]  ;;  %v454_v6 = vld [vmem:[%s2354_s14 + $0xc8] sm:$0xff]  ;;  %v456_v7 = vld [vmem:[%s2354_s14 + $0xd8] sm:$0xff]  ;;  %544 = vperm.xlu1 %2012, %v346_v41   ;;  %s3011_s21 = scalar_lea.sflag [#allocation4], %s270_s9  ;;  %s2121_s16 = scalar_lea.vmem %s3005_s11, 4096 }
  0x3e   : > { %v475_v8 = vpack.c.bf16 %v459_v5, %v457_v3  ;;  %v474_v9 = vpack.c.bf16 %v456_v7, %v454_v6  ;;  %v453_v10 = vld [vmem:[%s2354_s14 + $0xc0] sm:$0xff]  ;;  %v455_v11 = vld [vmem:[%s2354_s14 + $0xd0] sm:$0xff]  ;;  %v450_v12 = vld [vmem:[%s2354_s14 + $0xa8] sm:$0xff]  ;;  %p2122_p8 = scmp.ne.s32.totalorder %s3005_s11, %s2121_s16 }
  0x3f   : > { %861 = vmatprep.subr.bf16.mxu0 %v476_v4  ;;  %v452_v13 = vld [vmem:[%s2354_s14 + $0xb8] sm:$0xff]  ;;  %v473_v14 = vpack.c.bf16 %v455_v11, %v453_v10  ;;  %v449_v16 = vld [vmem:[%s2354_s14 + $0xa0] sm:$0xff]  ;;  %v451_v17 = vld [vmem:[%s2354_s14 + $0xb0] sm:$0xff] }
  0x40   : > { %862 = vmatpush1.bf16.msra.mxu0 %v475_v8  ;;  %v472_v15 = vpack.c.bf16 %v452_v13, %v450_v12  ;;  %v446_v18 = vld [vmem:[%s2354_s14 + $0x88] sm:$0xff]  ;;  %v448_v19 = vld [vmem:[%s2354_s14 + $0x98] sm:$0xff]  ;;  %v471_v20 = vpack.c.bf16 %v451_v17, %v449_v16  ;;  %v445_v22 = vld [vmem:[%s2354_s14 + $0x80] sm:$0xff]  ;;  %529 = vperm.xlu0 %2011, %v343_v48   ;;  %p2123_p11 = pnand %p2122_p8, %p3089_p10 }
  0x41   : > { %863 = vmatprep.subr.bf16.mxu0 %v474_v9  ;;  %v470_v21 = vpack.c.bf16 %v448_v19, %v446_v18  ;;  %v447_v23 = vld [vmem:[%s2354_s14 + $0x90] sm:$0xff]  ;;  %v442_v24 = vld [vmem:[%s2354_s14 + $0x68] sm:$0xff]  ;;  %v444_v25 = vld [vmem:[%s2354_s14 + $0x78] sm:$0xff]  ;;  %534 = vperm.xlu1 %2012, %v344_v49  }
  0x42   : > { %v441_v26 = vld [vmem:[%s2354_s14 + $0x60] sm:$0xff]  ;;  %v469_v27 = vpack.c.bf16 %v447_v23, %v445_v22  ;;  %v443_v28 = vld [vmem:[%s2354_s14 + $0x70] sm:$0xff]  ;;  %v468_v29 = vpack.c.bf16 %v444_v25, %v442_v24  ;;  %v438_v30 = vld [vmem:[%s2354_s14 + $0x48] sm:$0xff]  ;;  %p2124_p13 = pneg %p2123_p11 }
  0x43   : > { %v440_v31 = vld [vmem:[%s2354_s14 + $0x58] sm:$0xff]  ;;  %v437_v32 = vld [vmem:[%s2354_s14 + $0x40] sm:$0xff]  ;;  %v467_v33 = vpack.c.bf16 %v443_v28, %v441_v26  ;;  %v439_v34 = vld [vmem:[%s2354_s14 + $0x50] sm:$0xff] }
  0x44   : > { %864 = vmatpush1.bf16.msra.mxu0 %v473_v14  ;;  %v466_v36 = vpack.c.bf16 %v440_v31, %v438_v30  ;;  %v434_v37 = vld [vmem:[%s2354_s14 + $0x28] sm:$0xff]  ;;  %v436_v39 = vld [vmem:[%s2354_s14 + $0x38] sm:$0xff]  ;;  %v465_v42 = vpack.c.bf16 %v439_v34, %v437_v32  ;;  %v433_v43 = vld [vmem:[%s2354_s14 + $0x20] sm:$0xff]  ;;  %519 = vperm.xlu0 %2011, %v341_v54  }
  0x45   : > { %865 = vmatprep.subr.bf16.mxu0 %v472_v15  ;;  %v464_v44 = vpack.c.bf16 %v436_v39, %v434_v37  ;;  %v435_v45 = vld [vmem:[%s2354_s14 + $0x30] sm:$0xff]  ;;  %v430_v46 = vld [vmem:[%s2354_s14 + $0x8] sm:$0xff]  ;;  %v432_v47 = vld [vmem:[%s2354_s14 + $0x18] sm:$0xff]  ;;  %524 = vperm.xlu1 %2012, %v342_v55  }
  0x46   : > { %v463_v50 = vpack.c.bf16 %v435_v45, %v433_v43  ;;  %v462_v51 = vpack.c.bf16 %v432_v47, %v430_v46  ;;  %v429_v52 = vld [vmem:[%s2354_s14] sm:$0xff]  ;;  %v431_v53 = vld [vmem:[%s2354_s14 + $0x10] sm:$0xff]  ;;  %v336_v1 = vld [vmem:[%s3058_s2 + $0x18] sm:$0xff]  ;;  %s2125_s14 = sshll.u32 %s2214_s17, 4  ;;  %s2126_s14 = int_to_ptr.vmem [resolvable:$false] %s2125_s14 }
  0x47   : > { %v461_v56 = vpack.c.bf16 %v431_v53, %v429_v52  ;;  %v333_v2 = vld [vmem:[%s3058_s2] sm:$0xff]  ;;  %v334_v3 = vld [vmem:[%s3058_s2 + $0x8] sm:$0xff]  ;;  %v363_v4 = vld [vmem:[%s3058_s2 + $0xf0] sm:$0xff]  ;;  %s2127_s24 = scalar_lea.vmem %s2126_s14, 8192  ;;  %p2128_p0 = scmp.lt.s32.totalorder %s3005_s11, %s2126_s14 }
  0x48   : > { %866 = vmatpush1.bf16.msra.mxu0 %v471_v20  ;;  %509 = vperm.xlu0 %2011, %v339_v57   ;;  %v2015_v5 = vld [vmem:[#allocation2 + $0x10] sm:$0xff]   ;;  %v364_v6 = vld [vmem:[%s3058_s2 + $0xf8] sm:$0xff]  ;;  %v361_v7 = vld [vmem:[%s3058_s2 + $0xe0] sm:$0xff]  ;;  %p2129_p6 = scmp.lt.s32.totalorder %s2127_s24, %s2121_s16 }
  0x49   : > { %867 = vmatprep.subr.bf16.mxu0 %v470_v21  ;;  %514 = vperm.xlu1 %2012, %v340_v59   ;;  %v362_v8 = vld [vmem:[%s3058_s2 + $0xe8] sm:$0xff]  ;;  %v2016_v9 = vld [vmem:[#allocation2 + $0x18] sm:$0xff]   ;;  %v359_v10 = vld [vmem:[%s3058_s2 + $0xd0] sm:$0xff] }
  0x4a   : > { %v360_v11 = vld [vmem:[%s3058_s2 + $0xd8] sm:$0xff]  ;;  %v357_v12 = vld [vmem:[%s3058_s2 + $0xc0] sm:$0xff]  ;;  %v358_v13 = vld [vmem:[%s3058_s2 + $0xc8] sm:$0xff]  ;;  %p2130_p7 = por %p2129_p6, %p2128_p0 }
  0x4b   : > { %v2017_v14 = vld [vmem:[#allocation2 + $0x20] sm:$0xff]   ;;  %v355_v15 = vld [vmem:[%s3058_s2 + $0xb0] sm:$0xff]  ;;  %v356_v16 = vld [vmem:[%s3058_s2 + $0xb8] sm:$0xff] }
  0x4c   : > { %868 = vmatpush1.bf16.msra.mxu0 %v469_v27  ;;  %499 = vperm.xlu0 %2011, %v337_v60   ;;  %v353_v17 = vld [vmem:[%s3058_s2 + $0xa0] sm:$0xff]  ;;  %v354_v18 = vld [vmem:[%s3058_s2 + $0xa8] sm:$0xff]  ;;  %v351_v19 = vld [vmem:[%s3058_s2 + $0x90] sm:$0xff]  ;;  %p2131_p9 = pnand %p2130_p7, %p2124_p13 }
  0x4d   : > { %869 = vmatprep.subr.bf16.mxu0 %v468_v29  ;;  %504 = vperm.xlu1 %2012, %v338_v61   ;;  %v2018_v20 = vld [vmem:[#allocation2 + $0x28] sm:$0xff]   ;;  %v352_v21 = vld [vmem:[%s3058_s2 + $0x98] sm:$0xff]  ;;  %v349_v22 = vld [vmem:[%s3058_s2 + $0x80] sm:$0xff] }
  0x4e   : > { %v350_v23 = vld [vmem:[%s3058_s2 + $0x88] sm:$0xff]  ;;  %v379_v24 = vld [vmem:[%s3058_s2 + $0x170] sm:$0xff]  ;;  %v380_v26 = vld [vmem:[%s3058_s2 + $0x178] sm:$0xff] }
  0x4f   : > { %v2019_v25 = vld [vmem:[#allocation2 + $0x30] sm:$0xff]   ;;  %v377_v27 = vld [vmem:[%s3058_s2 + $0x160] sm:$0xff]  ;;  %v378_v28 = vld [vmem:[%s3058_s2 + $0x168] sm:$0xff] }
  0x50   : > { %870 = vmatpush1.bf16.msra.mxu0 %v467_v33  ;;  %489 = vperm.xlu0 %2011, %v335_v63   ;;  %v375_v29 = vld [vmem:[%s3058_s2 + $0x150] sm:$0xff]  ;;  %v2020_v30 = vld [vmem:[#allocation2 + $0x38] sm:$0xff]   ;;  %v373_v32 = vld [vmem:[%s3058_s2 + $0x140] sm:$0xff] }
  0x51   : > { %871 = vmatprep.subr.bf16.mxu0 %v466_v36  ;;  %494 = vperm.xlu1 %2012, %v336_v1   ;;  %v376_v31 = vld [vmem:[%s3058_s2 + $0x158] sm:$0xff]  ;;  %v374_v33 = vld [vmem:[%s3058_s2 + $0x148] sm:$0xff]  ;;  %v371_v34 = vld [vmem:[%s3058_s2 + $0x130] sm:$0xff] }
  0x52   : > { %v372_v36 = vld [vmem:[%s3058_s2 + $0x138] sm:$0xff]  ;;  %v369_v37 = vld [vmem:[%s3058_s2 + $0x120] sm:$0xff]  ;;  %v370_v38 = vld [vmem:[%s3058_s2 + $0x128] sm:$0xff] }
  0x53   : > { %v367_v39 = vld [vmem:[%s3058_s2 + $0x110] sm:$0xff]  ;;  %v2022_v40 = vld [vmem:[#allocation2 + $0x48] sm:$0xff]   ;;  %v368_v41 = vld [vmem:[%s3058_s2 + $0x118] sm:$0xff] }
  0x54   : > { %872 = vmatpush1.bf16.msra.mxu0 %v465_v42  ;;  %479 = vperm.xlu0 %2011, %v333_v2   ;;  %v365_v42 = vld [vmem:[%s3058_s2 + $0x100] sm:$0xff]  ;;  %v366_v43 = vld [vmem:[%s3058_s2 + $0x108] sm:$0xff]  ;;  %v2023_v45 = vld [vmem:[#allocation2 + $0x50] sm:$0xff]  }
  0x55   : > { %873 = vmatprep.subr.bf16.mxu0 %v464_v44  ;;  %484 = vperm.xlu1 %2012, %v334_v3   ;;  %v413_v44 = vld [vmem:[%s3060_s4] sm:$0xff]  ;;  %v414_v46 = vld [vmem:[%s3060_s4 + $0x8] sm:$0xff]  ;;  %v415_v47 = vld [vmem:[%s3060_s4 + $0x10] sm:$0xff] }
  0x56   : > { %v416_v48 = vld [vmem:[%s3060_s4 + $0x18] sm:$0xff]  ;;  %v417_v49 = vld [vmem:[%s3060_s4 + $0x20] sm:$0xff]  ;;  %v419_v52 = vld [vmem:[%s3060_s4 + $0x30] sm:$0xff] }
  0x57   : > { %v420_v53 = vld [vmem:[%s3060_s4 + $0x38] sm:$0xff]  ;;  %v421_v54 = vld [vmem:[%s3060_s4 + $0x40] sm:$0xff]  ;;  %v423_v57 = vld [vmem:[%s3060_s4 + $0x50] sm:$0xff] }
  0x58   : > { %874 = vmatpush1.bf16.msra.mxu0 %v463_v50  ;;  %629 = vperm.xlu0 %2011, %v363_v4   ;;  %v2024_v50 = vld [vmem:[#allocation2 + $0x58] sm:$0xff]   ;;  %v2025_v55 = vld [vmem:[#allocation2 + $0x60] sm:$0xff]   ;;  %v2026_v60 = vld [vmem:[#allocation2 + $0x68] sm:$0xff]  }
  0x59   : > { %875 = vmatprep.subr.bf16.mxu0 %v462_v51  ;;  %634 = vperm.xlu1 %2012, %v364_v6   ;;  %v418_v51 = vld [vmem:[%s3060_s4 + $0x28] sm:$0xff]  ;;  %v425_v59 = vld [vmem:[%s3060_s4 + $0x60] sm:$0xff]  ;;  %v428_v63 = vld [vmem:[%s3060_s4 + $0x78] sm:$0xff] }
  0x5a   : > { %v426_v61 = vld [vmem:[%s3060_s4 + $0x68] sm:$0xff]  ;;  %v2027_v1 = vld [vmem:[#allocation2 + $0x70] sm:$0xff]   ;;  %v2028_v2 = vld [vmem:[#allocation2 + $0x78] sm:$0xff]  }
  0x5b   : > { %v2029_v3 = vld [vmem:[#allocation2 + $0x80] sm:$0xff]   ;;  %v2030_v4 = vld [vmem:[#allocation2 + $0x88] sm:$0xff]   ;;  %v2032_v6 = vld [vmem:[#allocation2 + $0x98] sm:$0xff]  }
  0x5c   : > { %876 = vmatpush1.bf16.msra.mxu0 %v461_v56  ;;  %619 = vperm.xlu0 %2011, %v361_v7   ;;  %v422_v56 = vld [vmem:[%s3060_s4 + $0x48] sm:$0xff] }
  0x5d   : > { %624 = vperm.xlu1 %2012, %v362_v8  }
  0x5f   : > { %894 = vmatmul.mubr.bf16.vlgmr.msra.gmra.mxu0 %v2013_v58  ;;  %v424_v58 = vld [vmem:[%s3060_s4 + $0x58] sm:$0xff] }
  0x60   : > { %903 = vmatprep.mubr.bf16.mxu0 %v3063_v0  ;;  %609 = vperm.xlu0 %2011, %v359_v10  }
  0x61   : > { %614 = vperm.xlu1 %2012, %v360_v11  }
  0x64   : > { %599 = vperm.xlu0 %2011, %v357_v12   ;;  %v2034_v12 = vld [vmem:[#allocation2 + $0xa8] sm:$0xff]  }
  0x65   : > { %604 = vperm.xlu1 %2012, %v358_v13  }
  0x67   : > { %904 = vmatmul.mubr.bf16.gmra.mxu0 %v2014_v62  ;;  %v427_v62 = vld [vmem:[%s3060_s4 + $0x70] sm:$0xff] }
  0x68   : > { %913 = vmatprep.mubr.bf16.mxu0 %v3063_v0  ;;  %589 = vperm.xlu0 %2011, %v355_v15  }
  0x69   : > { %594 = vperm.xlu1 %2012, %v356_v16   ;;  %v2035_v16 = vld [vmem:[#allocation2 + $0xb0] sm:$0xff]  }
  0x6c   : > { %579 = vperm.xlu0 %2011, %v353_v17  }
  0x6d   : > { %584 = vperm.xlu1 %2012, %v354_v18  }
  0x6f   : > { %914 = vmatmul.mubr.bf16.gmra.mxu0 %v2015_v5  ;;  %v2031_v5 = vld [vmem:[#allocation2 + $0x90] sm:$0xff]  }
  0x70   : > { %923 = vmatprep.mubr.bf16.mxu0 %v3063_v0  ;;  %569 = vperm.xlu0 %2011, %v351_v19  }
  0x71   : > { %574 = vperm.xlu1 %2012, %v352_v21  }
  0x74   : > { %559 = vperm.xlu0 %2011, %v349_v22  }
  0x75   : > { %564 = vperm.xlu1 %2012, %v350_v23  }
  0x77   : > { %924 = vmatmul.mubr.bf16.gmra.mxu0 %v2016_v9  ;;  %v2033_v9 = vld [vmem:[#allocation2 + $0xa0] sm:$0xff]  }
  0x78   : > { %933 = vmatprep.mubr.bf16.mxu0 %v3063_v0  ;;  %709 = vperm.xlu0 %2011, %v379_v24  }
  0x79   : > { %714 = vperm.xlu1 %2012, %v380_v26  }
  0x7c   : > { %699 = vperm.xlu0 %2011, %v377_v27  }
  0x7d   : > { %704 = vperm.xlu1 %2012, %v378_v28  }
  0x7f   : > { %934 = vmatmul.mubr.bf16.gmra.mxu0 %v2017_v14 }
  0x80   : > { %943 = vmatprep.mubr.bf16.mxu0 %v3063_v0  ;;  %689 = vperm.xlu0 %2011, %v375_v29  }
  0x81   : > { %694 = vperm.xlu1 %2012, %v376_v31  }
  0x84   : > { %679 = vperm.xlu0 %2011, %v373_v32  }
  0x85   : > { %684 = vperm.xlu1 %2012, %v374_v33  }
  0x87   : > { %944 = vmatmul.mubr.bf16.gmra.mxu0 %v2018_v20  ;;  %v2036_v20 = vld [vmem:[#allocation2 + $0xb8] sm:$0xff]  }
  0x88   : > { %953 = vmatprep.mubr.bf16.mxu0 %v3063_v0  ;;  %669 = vperm.xlu0 %2011, %v371_v34  }
  0x89   : > { %674 = vperm.xlu1 %2012, %v372_v36  }
  0x8c   : > { %659 = vperm.xlu0 %2011, %v369_v37  }
  0x8d   : > { %664 = vperm.xlu1 %2012, %v370_v38  }
  0x8f   : > { %954 = vmatmul.mubr.bf16.gmra.mxu0 %v2019_v25 }
  0x90   : > { %963 = vmatprep.mubr.bf16.mxu0 %v3063_v0  ;;  %649 = vperm.xlu0 %2011, %v367_v39  }
  0x91   : > { %654 = vperm.xlu1 %2012, %v368_v41  }
  0x94   : > { %639 = vperm.xlu0 %2011, %v365_v42  }
  0x95   : > { %644 = vperm.xlu1 %2012, %v366_v43  }
  0x97   : > { %964 = vmatmul.mubr.bf16.gmra.mxu0 %v2020_v30 }
  0x98   : > { %973 = vmatprep.mubr.bf16.mxu0 %v3063_v0  ;;  %1280 = vperm.xlu0 %2011, %v413_v44  }
  0x99   : > { %1285 = vperm.xlu1 %2012, %v414_v46  }
  0x9c   : > { %1290 = vperm.xlu0 %2011, %v415_v47  }
  0x9d   : > { %1295 = vperm.xlu1 %2012, %v416_v48  }
  0x9f   : > { %974 = vmatmul.mubr.bf16.gmra.mxu0 %v2021_v35 }
  0xa0   : > { %983 = vmatprep.mubr.bf16.mxu0 %v3063_v0  ;;  %1300 = vperm.xlu0 %2011, %v417_v49  }
  0xa1   : > { %1305 = vperm.xlu1 %2012, %v418_v51  }
  0xa4   : > { %1310 = vperm.xlu0 %2011, %v419_v52  }
  0xa5   : > { %1315 = vperm.xlu1 %2012, %v420_v53  }
  0xa7   : > { %984 = vmatmul.mubr.bf16.gmra.mxu0 %v2022_v40 }
  0xa8   : > { %993 = vmatprep.mubr.bf16.mxu0 %v3063_v0  ;;  %1320 = vperm.xlu0 %2011, %v421_v54  }
  0xa9   : > { %1325 = vperm.xlu1 %2012, %v422_v56  }
  0xac   : > { %1330 = vperm.xlu0 %2011, %v423_v57  }
  0xad   : > { %1335 = vperm.xlu1 %2012, %v424_v58  }
  0xaf   : > { %994 = vmatmul.mubr.bf16.gmra.mxu0 %v2023_v45 }
  0xb0   : > { %1003 = vmatprep.mubr.bf16.mxu0 %v3063_v0  ;;  %1340 = vperm.xlu0 %2011, %v425_v59  }
  0xb1   : > { %1345 = vperm.xlu1 %2012, %v426_v61  }
  0xb3   : > { %v2599_v7 = vpop.permute.xlu0 %549 }
  0xb4   : > { %1350 = vperm.xlu0 %2011, %v427_v62   ;;  %v2602_v8 = vpop.permute.xlu1 %539 }
  0xb5   : > { %1355 = vperm.xlu1 %2012, %v428_v63  }
  0xb7   : > { %1004 = vmatmul.mubr.bf16.gmra.mxu0 %v2024_v50  ;;  %v2604_v10 = vpop.permute.xlu0 %554 }
  0xb8   : > { %1013 = vmatprep.mubr.bf16.mxu0 %v3063_v0  ;;  %v2606_v11 = vpop.permute.xlu1 %544 }
  0xbb   : > { %v2609_v13 = vpop.permute.xlu0 %529 }
  0xbc   : > { %v2611_v14 = vpop.permute.xlu1 %534 }
  0xbf   : > { %1014 = vmatmul.mubr.bf16.gmra.mxu0 %v2025_v55  ;;  %v2614_v15 = vpop.permute.xlu0 %519 }
  0xc0   : > { %1023 = vmatprep.mubr.bf16.mxu0 %v3063_v0  ;;  %v2616_v17 = vpop.permute.xlu1 %524 }
  0xc3   : > { %v2618_v18 = vpop.permute.xlu0 %509 }
  0xc4   : > { %v2621_v19 = vpop.permute.xlu1 %514 }
  0xc7   : > { %1024 = vmatmul.mubr.bf16.gmra.mxu0 %v2026_v60  ;;  %v2623_v21 = vpop.permute.xlu0 %499 }
  0xc8   : > { %1033 = vmatprep.mubr.bf16.mxu0 %v3063_v0  ;;  %v2625_v22 = vpop.permute.xlu1 %504 }
  0xcb   : > { %v490_v23 = vpop.permute.xlu0 %489 }
  0xcc   : > { %v495_v24 = vpop.permute.xlu1 %494 }
  0xcf   : > { %1034 = vmatmul.mubr.bf16.gmra.mxu0 %v2027_v1  ;;  %v480_v26 = vpop.permute.xlu0 %479 }
  0xd0   : > { %1043 = vmatprep.mubr.bf16.mxu0 %v3063_v0  ;;  %v485_v29 = vpop.permute.xlu1 %484 }
  0xd3   : > { %v2645_v60 = vpop.permute.xlu0 %629 }
  0xd4   : > { %v2649_v62 = vpop.permute.xlu1 %634 }
  0xd7   : > { %1044 = vmatmul.mubr.bf16.gmra.mxu0 %v2028_v2  ;;  %v2655_v2 = vpop.permute.xlu0 %619 }
  0xd8   : > { %1053 = vmatprep.mubr.bf16.mxu0 %v3063_v0 }
  0xdf   : > { %1054 = vmatmul.mubr.bf16.gmra.mxu0 %v2029_v3 }
  0xe0   : > { %1063 = vmatprep.mubr.bf16.mxu0 %v3063_v0 }
  0xe7   : > { %1064 = vmatmul.mubr.bf16.gmra.mxu0 %v2030_v4  ;;  %v2659_v4 = vpop.permute.xlu1 %624 }
  0xe8   : > { %1073 = vmatprep.mubr.bf16.mxu0 %v3063_v0 }
  0xef   : > { %1074 = vmatmul.mubr.bf16.gmra.mxu0 %v2031_v5 }
  0xf0   : > { %1083 = vmatprep.mubr.bf16.mxu0 %v3063_v0 }
  0xf7   : > { %1084 = vmatmul.mubr.bf16.gmra.mxu0 %v2032_v6  ;;  %v2039_v6 = vld [vmem:[#allocation5 + $0x4] ss:$12 sps:$4 sm:$0xff]  }
  0xf8   : > { %1093 = vmatprep.mubr.bf16.mxu0 %v3063_v0  ;;  %1518 = vmatprep.mubr.bf16.mxu1 %v2039_v6 }
  0xff   : > { %1094 = vmatmul.mubr.bf16.gmra.mxu0 %v2033_v9 }
 0x100   : > { %1103 = vmatprep.mubr.bf16.mxu0 %v3063_v0 }
 0x107   : > { %1104 = vmatmul.mubr.bf16.gmra.mxu0 %v2034_v12  ;;  %v2663_v12 = vpop.permute.xlu0 %609 }
 0x108   : > { %1113 = vmatprep.mubr.bf16.mxu0 %v3063_v0 }
 0x10f   : > { %1114 = vmatmul.mubr.bf16.gmra.mxu0 %v2035_v16 }
 0x110   : > { %1123 = vmatprep.mubr.bf16.mxu0 %v3063_v0 }
 0x117   : > { %1124 = vmatmul.mubr.bf16.gmra.mxu0 %v2036_v20  ;;  %v2665_v20 = vpop.permute.xlu1 %614 }
 0x11f   : > { %v895_v25 = vpop.f32.mrf.mxu0 }
 0x120   : > { %v896_v28 = vadd.f32 %v895_v25, %v480_v26 }
 0x121   : > { %v897_v27 = vpop.f32.mrf.mxu0 }
 0x122   : > { %v898_v31 = vadd.f32 %v897_v27, %v480_v26  ;;  %v1134_v34 = vmax.f32 %v896_v28, 0.0  ;;  %v2669_v27 = vpop.permute.xlu1 %604 }
 0x123   : > { %v899_v30 = vpop.f32.mrf.mxu0 }
 0x124   : > { %v900_v32 = vadd.f32 %v899_v30, %v485_v29  ;;  %v1135_v38 = vmax.f32 %v898_v31, 0.0 }
 0x125   : > { %v901_v33 = vpop.f32.mrf.mxu0 }
 0x126   : > { %v1136_v35 = vmax.f32 %v900_v32, 0.0  ;;  %v902_v36 = vadd.f32 %v901_v33, %v485_v29  ;;  %v2673_v31 = vpop.permute.xlu1 %594 }
 0x127   : > { %v905_v37 = vpop.f32.mrf.mxu0  ;;  %3078 = vst [vmem:[#allocation13_spill] sm:$0xff] %v2673_v31 }
 0x128   : > { %v2627_v39 = vpack.c.bf16 %v1136_v35, %v1134_v34  ;;  %v1137_v40 = vmax.f32 %v902_v36, 0.0  ;;  %v906_v43 = vadd.f32 %v905_v37, %v490_v23 }
 0x129   : > { %v907_v41 = vpop.f32.mrf.mxu0 }
 0x12a   : > { %v2629_v42 = vpack.c.bf16 %v1137_v40, %v1135_v38  ;;  %v908_v45 = vadd.f32 %v907_v41, %v490_v23  ;;  %v1138_v48 = vmax.f32 %v906_v43, 0.0  ;;  %v2677_v36 = vpop.permute.xlu1 %584 }
 0x12b   : > { %v909_v44 = vpop.f32.mrf.mxu0  ;;  %3080 = vst [vmem:[#allocation15_spill] sm:$0xff] %v2677_v36 }
 0x12c   : > { %v910_v46 = vadd.f32 %v909_v44, %v495_v24  ;;  %v1139_v52 = vmax.f32 %v908_v45, 0.0 }
 0x12d   : > { %v911_v47 = vpop.f32.mrf.mxu0 }
 0x12e   : > { %v1140_v49 = vmax.f32 %v910_v46, 0.0  ;;  %v912_v50 = vadd.f32 %v911_v47, %v495_v24  ;;  %v2667_v24 = vpop.permute.xlu0 %599  ;;  %v2685_v47 = vpop.permute.xlu1 %574 }
 0x12f   : > { %v2631_v51 = vpop.f32.mrf.mxu0  ;;  %3076 = vst [vmem:[#allocation11_spill] sm:$0xff] %v2667_v24 }
 0x130   : > { %v2633_v53 = vpack.c.bf16 %v1140_v49, %v1138_v48  ;;  %v1141_v54 = vmax.f32 %v912_v50, 0.0 }
 0x131   : > { %v2635_v55 = vpop.f32.mrf.mxu0 }
 0x132   : > { %v2637_v56 = vpack.c.bf16 %v1141_v54, %v1139_v52  ;;  %v2671_v29 = vpop.permute.xlu0 %589 }
 0x133   : > { %v2639_v57 = vpop.f32.mrf.mxu0  ;;  %3077 = vst [vmem:[#allocation12_spill] sm:$0xff] %v2671_v29 }
 0x135   : > { %v2641_v58 = vpop.f32.mrf.mxu0 }
 0x136   : > { %v2675_v34 = vpop.permute.xlu0 %579 }
 0x137   : > { %v2643_v59 = vpop.f32.mrf.mxu0  ;;  %3079 = vst [vmem:[#allocation14_spill] sm:$0xff] %v2675_v34 }
 0x139   : > { %v2647_v61 = vpop.f32.mrf.mxu0 }
 0x13a   : > { %v2679_v40 = vpop.permute.xlu0 %569 }
 0x13b   : > { %v2651_v63 = vpop.f32.mrf.mxu0 }
 0x13d   : > { %v2653_v1 = vpop.f32.mrf.mxu0 }
 0x13f   : > { %v2657_v3 = vpop.f32.mrf.mxu0 }
 0x141   : > { %v937_v5 = vpop.f32.mrf.mxu0 }
 0x143   : > { %v2661_v9 = vpop.f32.mrf.mxu0 }
 0x145   : > { %v941_v16 = vpop.f32.mrf.mxu0 }
 0x147   : > { %v945_v23 = vpop.f32.mrf.mxu0 }
 0x149   : > { %v947_v25 = vpop.f32.mrf.mxu0 }
 0x14a   : > { %v948_v29 = vadd.f32 %v947_v25, %v2609_v13  ;;  %v938_v25 = vadd.f32 %v937_v5, %v2614_v15 }
 0x14b   : > { %v949_v26 = vpop.f32.mrf.mxu0 }
 0x14d   : > { %v951_v28 = vpop.f32.mrf.mxu0 }
 0x14e   : > { %v952_v0 = vadd.f32 %v951_v28, %v2611_v14 }
 0x14f   : > { %v955_v30 = vpop.f32.mrf.mxu0 }
 0x151   : > { %v957_v32 = vpop.f32.mrf.mxu0 }
 0x152   : > { %v958_v49 = vadd.f32 %v957_v32, %v2602_v8 }
 0x153   : > { %v959_v33 = vpop.f32.mrf.mxu0 }
 0x154   : > { %v960_v52 = vadd.f32 %v959_v33, %v2606_v11  ;;  %v1159_v24 = vmax.f32 %v958_v49, 0.0 }
 0x155   : > { %v961_v35 = vpop.f32.mrf.mxu0 }
 0x156   : > { %v962_v43 = vadd.f32 %v961_v35, %v2606_v11  ;;  %v950_v11 = vadd.f32 %v949_v26, %v2611_v14  ;;  %v1160_v33 = vmax.f32 %v960_v52, 0.0  ;;  %v1155_v14 = vmax.f32 %v948_v29, 0.0 }
 0x157   : > { %v965_v37 = vpop.f32.mrf.mxu0 }
 0x158   : > { %v966_v46 = vadd.f32 %v965_v37, %v2599_v7  ;;  %v1161_v35 = vmax.f32 %v962_v43, 0.0 }
 0x159   : > { %v967_v38 = vpop.f32.mrf.mxu0 }
 0x15a   : > { %v968_v44 = vadd.f32 %v967_v38, %v2599_v7  ;;  %v1162_v36 = vmax.f32 %v966_v46, 0.0  ;;  %v560_v7 = vpop.permute.xlu0 %559 }
 0x15b   : > { %v969_v41 = vpop.f32.mrf.mxu0 }
 0x15c   : > { %v970_v45 = vadd.f32 %v969_v41, %v2604_v10  ;;  %v1163_v34 = vmax.f32 %v968_v44, 0.0  ;;  %v956_v41 = vadd.f32 %v955_v30, %v2602_v8  ;;  %v1157_v44 = vmax.f32 %v952_v0, 0.0 }
 0x15d   : > { %v971_v48 = vpop.f32.mrf.mxu0  ;;  %v932_v30 = vadd.f32 %v2653_v1, %v2621_v19  ;;  %v940_v0 = vadd.f32 %v2661_v9, %v2616_v17 }
 0x15e   : > { %v972_v50 = vadd.f32 %v971_v48, %v2604_v10  ;;  %v1164_v54 = vmax.f32 %v970_v45, 0.0  ;;  %v942_v10 = vadd.f32 %v941_v16, %v2616_v17  ;;  %v565_v45 = vpop.permute.xlu1 %564  ;;  %v1243_v48 = vpack.c.bf16 %v1161_v35, %v1159_v24 }
 0x15f   : > { %v975_v6 = vpop.f32.mrf.mxu0  ;;  %v1158_v46 = vmax.f32 %v956_v41, 0.0  ;;  %v1241_v1 = vpack.c.bf16 %v1157_v44, %v1155_v14  ;;  %v1151_v41 = vmax.f32 %v938_v25, 0.0 }
 0x160   : > { %v1165_v38 = vmax.f32 %v972_v50, 0.0  ;;  %v976_v32 = vadd.f32 %v975_v6, %v560_v7  ;;  %v1244_v43 = vpack.c.bf16 %v1164_v54, %v1162_v36  ;;  %v1153_v24 = vmax.f32 %v942_v10, 0.0 }
 0x161   : > { %v977_v37 = vpop.f32.mrf.mxu0  ;;  %v1242_v36 = vpack.c.bf16 %v1160_v33, %v1158_v46  ;;  %v1149_v10 = vmax.f32 %v932_v30, 0.0  ;;  %v916_v46 = vadd.f32 %v2631_v51, %v2623_v21 }
 0x162   : > { %v1245_v31 = vpack.c.bf16 %v1165_v38, %v1163_v34  ;;  %v978_v50 = vadd.f32 %v977_v37, %v560_v7  ;;  %v946_v34 = vadd.f32 %v945_v23, %v2609_v13  ;;  %v1166_v26 = vmax.f32 %v976_v32, 0.0 }
 0x163   : > { %v979_v28 = vpop.f32.mrf.mxu0  ;;  %v936_v23 = vadd.f32 %v2657_v3, %v2614_v15  ;;  %v928_v38 = vadd.f32 %v2647_v61, %v2618_v18  ;;  %v922_v7 = vadd.f32 %v2641_v58, %v2625_v22  ;;  %v930_v37 = vadd.f32 %v2651_v63, %v2621_v19 }
 0x164   : > { %v980_v8 = vadd.f32 %v979_v28, %v565_v45  ;;  %1486 = vmatprep.subr.bf16.mxu1 %v1245_v31  ;;  %v1156_v31 = vmax.f32 %v950_v11, 0.0  ;;  %v1167_v6 = vmax.f32 %v978_v50, 0.0  ;;  %v1154_v29 = vmax.f32 %v946_v34, 0.0 }
 0x165   : > { %v981_v16 = vpop.f32.mrf.mxu0  ;;  %1487 = vmatpush1.bf16.msra.mxu1 %v1244_v43  ;;  %v1152_v32 = vmax.f32 %v940_v0, 0.0  ;;  %v1239_v11 = vpack.c.bf16 %v1153_v24, %v1151_v41  ;;  %v926_v28 = vadd.f32 %v2643_v59, %v2618_v18  ;;  %v1150_v43 = vmax.f32 %v936_v23, 0.0 }
 0x166   : > { %v1168_v49 = vmax.f32 %v980_v8, 0.0  ;;  %v982_v52 = vadd.f32 %v981_v16, %v565_v45  ;;  %1488 = vmatprep.subr.bf16.mxu1 %v1243_v48  ;;  %v1240_v15 = vpack.c.bf16 %v1156_v31, %v1154_v29  ;;  %v918_v45 = vadd.f32 %v2635_v55, %v2623_v21  ;;  %v2737_v21 = vpop.permute.xlu0 %709 }
 0x167   : > { %v985_v54 = vpop.f32.mrf.mxu0  ;;  %v1147_v44 = vmax.f32 %v928_v38, 0.0  ;;  %v1145_v50 = vmax.f32 %v922_v7, 0.0  ;;  %v1148_v8 = vmax.f32 %v930_v37, 0.0  ;;  %v1238_v30 = vpack.c.bf16 %v1152_v32, %v1150_v43 }
 0x168   : > { %v2701_v5 = vpack.c.bf16 %v1168_v49, %v1166_v26  ;;  %v1169_v13 = vmax.f32 %v982_v52, 0.0  ;;  %v986_v9 = vadd.f32 %v985_v54, %v2679_v40  ;;  %v1146_v16 = vmax.f32 %v926_v28, 0.0 }
 0x169   : > { %v987_v35 = vpop.f32.mrf.mxu0  ;;  %1489 = vmatpush1.bf16.msra.mxu1 %v1242_v36  ;;  %v1237_v55 = vpack.c.bf16 %v1149_v10, %v1147_v44  ;;  %v1142_v0 = vmax.f32 %v916_v46, 0.0  ;;  %v2741_v36 = vpop.permute.xlu1 %714 }
 0x16a   : > { %v2707_v17 = vpack.c.bf16 %v1169_v13, %v1167_v6  ;;  %1490 = vmatprep.subr.bf16.mxu1 %v1241_v1  ;;  %v988_v33 = vadd.f32 %v987_v35, %v2679_v40  ;;  %v1170_v19 = vmax.f32 %v986_v9, 0.0  ;;  %v920_v40 = vadd.f32 %v2639_v57, %v2625_v22  ;;  %v2748_v6 = vpop.permute.xlu0 %699 }
 0x16b   : > { %v989_v3 = vpop.f32.mrf.mxu0  ;;  %v1236_v57 = vpack.c.bf16 %v1148_v8, %v1146_v16 }
 0x16c   : > { %v990_v61 = vadd.f32 %v989_v3, %v2685_v47  ;;  %v1171_v34 = vmax.f32 %v988_v33, 0.0  ;;  %v1144_v22 = vmax.f32 %v920_v40, 0.0 }
 0x16d   : > { %v991_v58 = vpop.f32.mrf.mxu0  ;;  %1491 = vmatpush1.bf16.msra.mxu1 %v1240_v15  ;;  %v2754_v23 = vpop.permute.xlu1 %704 }
 0x16e   : > { %v1172_v63 = vmax.f32 %v990_v61, 0.0  ;;  %v992_v48 = vadd.f32 %v991_v58, %v2685_v47  ;;  %1492 = vmatprep.subr.bf16.mxu1 %v1239_v11  ;;  %v1143_v47 = vmax.f32 %v918_v45, 0.0  ;;  %v1234_v31 = vpack.c.bf16 %v1144_v22, %v1142_v0  ;;  %v2759_v38 = vpop.permute.xlu0 %689 }
 0x16f   : > { %v2723_v25 = vpop.f32.mrf.mxu0 }
 0x170   : > { %v2725_v18 = vpack.c.bf16 %v1172_v63, %v1170_v19  ;;  %v1173_v59 = vmax.f32 %v992_v48, 0.0  ;;  %v1235_v52 = vpack.c.bf16 %v1145_v50, %v1143_v47 }
 0x171   : > { %v2729_v14 = vpop.f32.mrf.mxu0  ;;  %1493 = vmatpush1.bf16.msra.mxu1 %v1238_v30  ;;  %v2763_v41 = vpop.permute.xlu1 %694 }
 0x172   : > { %v2731_v26 = vpack.c.bf16 %v1173_v59, %v1171_v34  ;;  %1494 = vmatprep.subr.bf16.mxu1 %v1237_v55  ;;  %v2765_v37 = vpop.permute.xlu0 %679 }
 0x173   : > { %v2733_v49 = vpop.f32.mrf.mxu0 }
 0x175   : > { %v2735_v24 = vpop.f32.mrf.mxu0  ;;  %1495 = vmatpush1.bf16.msra.mxu1 %v1236_v57  ;;  %v2767_v32 = vpop.permute.xlu1 %684 }
 0x176   : > { %1496 = vmatprep.subr.bf16.mxu1 %v1235_v52  ;;  %v2769_v3 = vpop.permute.xlu0 %669 }
 0x177   : > { %v2739_v51 = vpop.f32.mrf.mxu0 }
 0x179   : > { %v2743_v54 = vpop.f32.mrf.mxu0  ;;  %1497 = vmatpush1.bf16.msra.mxu1 %v1234_v31  ;;  %v2771_v11 = vpop.permute.xlu1 %674 }
 0x17a   : > { %1498 = vmatprep.subr.bf16.mxu1 %v2637_v56  ;;  %v2773_v61 = vpop.permute.xlu0 %659 }
 0x17b   : > { %v2746_v1 = vpop.f32.mrf.mxu0  ;;  %3081 = vst [vmem:[#allocation16_spill] sm:$0xff] %v2773_v61 }
 0x17d   : > { %v2750_v13 = vpop.f32.mrf.mxu0  ;;  %1499 = vmatpush1.bf16.msra.mxu1 %v2633_v53  ;;  %v2775_v28 = vpop.permute.xlu1 %664 }
 0x17e   : > { %1500 = vmatprep.subr.bf16.mxu1 %v2629_v42  ;;  %v2777_v44 = vpop.permute.xlu0 %649 }
 0x17f   : > { %v2756_v29 = vpop.f32.mrf.mxu0 }
 0x181   : > { %v1017_v35 = vpop.f32.mrf.mxu0  ;;  %1501 = vmatpush1.bf16.msra.mxu1 %v2627_v39  ;;  %v2782_v50 = vpop.permute.xlu1 %654 }
 0x182   : > { %v640_v0 = vpop.permute.xlu0 %639 }
 0x183   : > { %v2761_v56 = vpop.f32.mrf.mxu0 }
 0x185   : > { %v1021_v9 = vpop.f32.mrf.mxu0 }
 0x187   : > { %v1025_v7 = vpop.f32.mrf.mxu0 }
 0x189   : > { %v1027_v53 = vpop.f32.mrf.mxu0 }
 0x18b   : > { %v1029_v42 = vpop.f32.mrf.mxu0 }
 0x18d   : > { %v1031_v15 = vpop.f32.mrf.mxu0 }
 0x18e   : > { %v1032_v47 = vadd.f32 %v1031_v15, %v2665_v20 }
 0x18f   : > { %v1035_v10 = vpop.f32.mrf.mxu0 }
 0x190   : > { %v1036_v31 = vadd.f32 %v1035_v10, %v2655_v2 }
 0x191   : > { %v1037_v39 = vpop.f32.mrf.mxu0 }
 0x192   : > { %v1038_v55 = vadd.f32 %v1037_v39, %v2655_v2  ;;  %v3082_v2 = vld [vmem:[#allocation13_spill] sm:$0xff] }
 0x193   : > { %v1039_v33 = vpop.f32.mrf.mxu0  ;;  %v1012_v10 = vadd.f32 %v2750_v13, %v3082_v2 }
 0x194   : > { %v1040_v59 = vadd.f32 %v1039_v33, %v2659_v4  ;;  %v1030_v33 = vadd.f32 %v1029_v42, %v2665_v20 }
 0x195   : > { %v1041_v45 = vpop.f32.mrf.mxu0 }
 0x196   : > { %v1042_v63 = vadd.f32 %v1041_v45, %v2659_v4  ;;  %v1022_v4 = vadd.f32 %v1021_v9, %v2669_v27 }
 0x197   : > { %v1045_v43 = vpop.f32.mrf.mxu0 }
 0x198   : > { %v1046_v8 = vadd.f32 %v1045_v43, %v2645_v60  ;;  %v1193_v22 = vmax.f32 %v1042_v63, 0.0  ;;  %v1191_v43 = vmax.f32 %v1038_v55, 0.0  ;;  %v1026_v55 = vadd.f32 %v1025_v7, %v2663_v12 }
 0x199   : > { %v1047_v58 = vpop.f32.mrf.mxu0 }
 0x19a   : > { %v1048_v48 = vadd.f32 %v1047_v58, %v2645_v60  ;;  %v1194_v45 = vmax.f32 %v1046_v8, 0.0  ;;  %v1028_v60 = vadd.f32 %v1027_v53, %v2663_v12  ;;  %v3083_v53 = vld [vmem:[#allocation11_spill] sm:$0xff] }
 0x19b   : > { %v1049_v19 = vpop.f32.mrf.mxu0  ;;  %v1018_v8 = vadd.f32 %v1017_v35, %v3083_v53  ;;  %v1016_v7 = vadd.f32 %v2756_v29, %v3083_v53 }
 0x19c   : > { %v1050_v40 = vadd.f32 %v1049_v19, %v2649_v62  ;;  %v1195_v57 = vmax.f32 %v1048_v48, 0.0  ;;  %v1189_v48 = vmax.f32 %v1032_v47, 0.0  ;;  %v1187_v9 = vmax.f32 %v1028_v60, 0.0 }
 0x19d   : > { %v1051_v30 = vpop.f32.mrf.mxu0  ;;  %v1185_v47 = vmax.f32 %v1022_v4, 0.0  ;;  %v1182_v53 = vmax.f32 %v1016_v7, 0.0 }
 0x19e   : > { %v1052_v34 = vadd.f32 %v1051_v30, %v2649_v62  ;;  %v1196_v46 = vmax.f32 %v1050_v40, 0.0  ;;  %v645_v62 = vpop.permute.xlu1 %644  ;;  %v1192_v40 = vmax.f32 %v1040_v59, 0.0  ;;  %v1259_v30 = vpack.c.bf16 %v1193_v22, %v1191_v43 }
 0x19f   : > { %v1055_v16 = vpop.f32.mrf.mxu0  ;;  %v1188_v22 = vmax.f32 %v1030_v33, 0.0  ;;  %v1257_v13 = vpack.c.bf16 %v1189_v48, %v1187_v9  ;;  %v1183_v43 = vmax.f32 %v1018_v8, 0.0  ;;  %v3086_v48 = vld [vmem:[#allocation14_spill] sm:$0xff] }
 0x1a0   : > { %v1197_v52 = vmax.f32 %v1052_v34, 0.0  ;;  %v1056_v19 = vadd.f32 %v1055_v16, %v640_v0  ;;  %v1260_v15 = vpack.c.bf16 %v1196_v46, %v1194_v45  ;;  %v1190_v16 = vmax.f32 %v1036_v31, 0.0 }
 0x1a1   : > { %v1057_v58 = vpop.f32.mrf.mxu0  ;;  %v1020_v46 = vadd.f32 %v2761_v56, %v2669_v27  ;;  %v1186_v31 = vmax.f32 %v1026_v55, 0.0 }
 0x1a2   : > { %v1261_v39 = vpack.c.bf16 %v1197_v52, %v1195_v57  ;;  %v1058_v34 = vadd.f32 %v1057_v58, %v640_v0  ;;  %v1198_v20 = vmax.f32 %v1056_v19, 0.0  ;;  %v1258_v52 = vpack.c.bf16 %v1192_v40, %v1190_v16 }
 0x1a3   : > { %v1059_v63 = vpop.f32.mrf.mxu0  ;;  %v1184_v4 = vmax.f32 %v1020_v46, 0.0  ;;  %v1256_v29 = vpack.c.bf16 %v1188_v22, %v1186_v31  ;;  %v1181_v40 = vmax.f32 %v1012_v10, 0.0 }
 0x1a4   : > { %v1060_v61 = vadd.f32 %v1059_v63, %v645_v62  ;;  %1502 = vmatprep.subr.bf16.mxu1 %v1261_v39  ;;  %v1199_v45 = vmax.f32 %v1058_v34, 0.0  ;;  %v3085_v39 = vld [vmem:[#allocation15_spill] sm:$0xff] }
 0x1a5   : > { %v1061_v57 = vpop.f32.mrf.mxu0  ;;  %1503 = vmatpush2.bf16.msra.mxu1 %v1260_v15  ;;  %v1002_v19 = vadd.f32 %v2735_v24, %v3085_v39  ;;  %v1255_v15 = vpack.c.bf16 %v1185_v47, %v1183_v43  ;;  %v2037_v43 = vld [vmem:[#allocation5] ss:$12 sps:$4 sm:$0xff]  }
 0x1a6   : > { %v1200_v42 = vmax.f32 %v1060_v61, 0.0  ;;  %v1062_v59 = vadd.f32 %v1061_v57, %v645_v62  ;;  %1504 = vmatprep.subr.bf16.mxu1 %v1259_v30  ;;  %v3084_v61 = vld [vmem:[#allocation12_spill] sm:$0xff]  ;;  %v1010_v62 = vadd.f32 %v2746_v1, %v3082_v2  ;;  %v998_v30 = vadd.f32 %v2729_v14, %v3086_v48 }
 0x1a7   : > { %v1065_v0 = vpop.f32.mrf.mxu0  ;;  %v1008_v60 = vadd.f32 %v2743_v54, %v3084_v61  ;;  %v1006_v34 = vadd.f32 %v2739_v51, %v3084_v61  ;;  %v1177_v10 = vmax.f32 %v1002_v19, 0.0  ;;  %v1254_v57 = vpack.c.bf16 %v1184_v4, %v1182_v53  ;;  %v2042_v4 = vld [vmem:[#allocation5 + $0x18] ss:$12 sps:$4 sm:$0xff]  }
 0x1a8   : > { %v2799_v35 = vpack.c.bf16 %v1200_v42, %v1198_v20  ;;  %v1201_v12 = vmax.f32 %v1062_v59, 0.0  ;;  %v1066_v56 = vadd.f32 %v1065_v0, %v2777_v44  ;;  %v1180_v16 = vmax.f32 %v1010_v62, 0.0 }
 0x1a9   : > { %v1067_v58 = vpop.f32.mrf.mxu0  ;;  %1505 = vmatpush2.bf16.msra.mxu1 %v1258_v52  ;;  %v1179_v8 = vmax.f32 %v1008_v60, 0.0  ;;  %v996_v59 = vadd.f32 %v2723_v25, %v3086_v48  ;;  %v1178_v46 = vmax.f32 %v1006_v34, 0.0  ;;  %v2048_v34 = vld [vmem:[#allocation5 + $0x48] ss:$12 sps:$4 sm:$0xff]  }
 0x1aa   : > { %v2805_v27 = vpack.c.bf16 %v1201_v12, %v1199_v45  ;;  %1506 = vmatprep.subr.bf16.mxu1 %v1257_v13  ;;  %v1068_v63 = vadd.f32 %v1067_v58, %v2777_v44  ;;  %v1202_v1 = vmax.f32 %v1066_v56, 0.0  ;;  %v1000_v44 = vadd.f32 %v2733_v49, %v3085_v39  ;;  %v2040_v39 = vld [vmem:[#allocation5 + $0x1c] ss:$12 sps:$4 sm:$0xff]  }
 0x1ab   : > { %v1069_v33 = vpop.f32.mrf.mxu0  ;;  %v1253_v14 = vpack.c.bf16 %v1181_v40, %v1179_v8  ;;  %v1252_v52 = vpack.c.bf16 %v1180_v16, %v1178_v46  ;;  %v1174_v45 = vmax.f32 %v996_v59, 0.0 }
 0x1ac   : > { %v1070_v54 = vadd.f32 %v1069_v33, %v2782_v50  ;;  %v1203_v20 = vmax.f32 %v1068_v63, 0.0  ;;  %v1176_v49 = vmax.f32 %v1000_v44, 0.0  ;;  %v2043_v33 = vld [vmem:[#allocation5 + $0x34] ss:$12 sps:$4 sm:$0xff]  }
 0x1ad   : > { %v1071_v24 = vpop.f32.mrf.mxu0  ;;  %1507 = vmatpush2.bf16.msra.mxu1 %v1256_v29 }
 0x1ae   : > { %v1204_v2 = vmax.f32 %v1070_v54, 0.0  ;;  %v1072_v55 = vadd.f32 %v1071_v24, %v2782_v50  ;;  %1508 = vmatprep.subr.bf16.mxu1 %v1255_v15  ;;  %v1175_v50 = vmax.f32 %v998_v30, 0.0  ;;  %v1250_v7 = vpack.c.bf16 %v1176_v49, %v1174_v45  ;;  %v2045_v15 = vld [vmem:[#allocation5 + $0x30] ss:$12 sps:$4 sm:$0xff]   ;;  %v2046_v54 = vld [vmem:[#allocation5 + $0x4c] ss:$12 sps:$4 sm:$0xff]  }
 0x1af   : > { %v2821_v9 = vpop.f32.mrf.mxu0  ;;  %v2049_v24 = vld [vmem:[#allocation5 + $0x64] ss:$12 sps:$4 sm:$0xff]   ;;  %v2051_v49 = vld [vmem:[#allocation5 + $0x60] ss:$12 sps:$4 sm:$0xff]   ;;  %v2052_v45 = vld [vmem:[#allocation5 + $0x7c] ss:$12 sps:$4 sm:$0xff]  }
 0x1b0   : > { %v2823_v51 = vpack.c.bf16 %v1204_v2, %v1202_v1  ;;  %v1205_v42 = vmax.f32 %v1072_v55, 0.0  ;;  %v1251_v13 = vpack.c.bf16 %v1177_v10, %v1175_v50 }
 0x1b1   : > { %v2827_v47 = vpop.f32.mrf.mxu0  ;;  %1509 = vmatpush2.bf16.msra.mxu1 %v1254_v57 }
 0x1b2   : > { %v2829_v22 = vpack.c.bf16 %v1205_v42, %v1203_v20  ;;  %1510 = vmatprep.subr.bf16.mxu1 %v1253_v14 }
 0x1b3   : > { %v2831_v0 = vpop.f32.mrf.mxu0 }
 0x1b5   : > { %v2833_v12 = vpop.f32.mrf.mxu0  ;;  %1511 = vmatpush2.bf16.msra.mxu1 %v1252_v52 }
 0x1b6   : > { %1512 = vmatprep.subr.bf16.mxu1 %v1251_v13 }
 0x1b7   : > { %v2835_v25 = vpop.f32.mrf.mxu0 }
 0x1b9   : > { %v2837_v31 = vpop.f32.mrf.mxu0  ;;  %1513 = vmatpush2.bf16.msra.mxu1 %v1250_v7 }
 0x1ba   : > { %1514 = vmatprep.subr.bf16.mxu1 %v2731_v26 }
 0x1bb   : > { %v2840_v58 = vpop.f32.mrf.mxu0 }
 0x1bd   : > { %v2842_v61 = vpop.f32.mrf.mxu0  ;;  %1515 = vmatpush2.bf16.msra.mxu1 %v2725_v18 }
 0x1be   : > { %1516 = vmatprep.subr.bf16.mxu1 %v2707_v17 }
 0x1bf   : > { %v2846_v60 = vpop.f32.mrf.mxu0 }
 0x1c1   : > { %v1097_v56 = vpop.f32.mrf.mxu0  ;;  %1517 = vmatpush2.bf16.msra.mxu1 %v2701_v5 }
 0x1c3   : > { %v1099_v19 = vpop.f32.mrf.mxu0 }
 0x1c4   : > { %1519 = vmatmul.mubr.bf16.vlgmr.msra.gmra.mxu1 %v2037_v43 }
 0x1c5   : > { %v1101_v62 = vpop.f32.mrf.mxu0  ;;  %1528 = vmatprep.mubr.bf16.mxu1 %v2040_v39 }
 0x1c7   : > { %v1105_v26 = vpop.f32.mrf.mxu0 }
 0x1c9   : > { %v1107_v29 = vpop.f32.mrf.mxu0 }
 0x1cb   : > { %v1109_v40 = vpop.f32.mrf.mxu0 }
 0x1cc   : > { %1529 = vmatmul.mubr.bf16.gmra.mxu1 %v2042_v4  ;;  %v1110_v39 = vadd.f32 %v1109_v40, %v2763_v41 }
 0x1cd   : > { %v1111_v18 = vpop.f32.mrf.mxu0  ;;  %1538 = vmatprep.mubr.bf16.mxu1 %v2043_v33 }
 0x1ce   : > { %v1112_v42 = vadd.f32 %v1111_v18, %v2763_v41  ;;  %v1220_v41 = vmax.f32 %v1110_v39, 0.0 }
 0x1cf   : > { %v1115_v17 = vpop.f32.mrf.mxu0 }
 0x1d0   : > { %v1116_v52 = vadd.f32 %v1115_v17, %v2748_v6  ;;  %v1221_v33 = vmax.f32 %v1112_v42, 0.0  ;;  %v1100_v17 = vadd.f32 %v1099_v19, %v2767_v32 }
 0x1d1   : > { %v1117_v63 = vpop.f32.mrf.mxu0 }
 0x1d2   : > { %v1118_v16 = vadd.f32 %v1117_v63, %v2748_v6  ;;  %v1222_v63 = vmax.f32 %v1116_v52, 0.0  ;;  %v1098_v6 = vadd.f32 %v1097_v56, %v2765_v37  ;;  %v1088_v56 = vadd.f32 %v2837_v31, %v2769_v3  ;;  %v3087_v31 = vld [vmem:[#allocation16_spill] sm:$0xff] }
 0x1d3   : > { %v1119_v48 = vpop.f32.mrf.mxu0  ;;  %v1216_v19 = vmax.f32 %v1100_v17, 0.0 }
 0x1d4   : > { %1539 = vmatmul.mubr.bf16.gmra.mxu1 %v2045_v15  ;;  %v1120_v14 = vadd.f32 %v1119_v48, %v2754_v23  ;;  %v1223_v7 = vmax.f32 %v1118_v16, 0.0  ;;  %v1106_v15 = vadd.f32 %v1105_v26, %v2759_v38  ;;  %v1076_v16 = vadd.f32 %v2821_v9, %v3087_v31 }
 0x1d5   : > { %v1121_v5 = vpop.f32.mrf.mxu0  ;;  %1548 = vmatprep.mubr.bf16.mxu1 %v2046_v54  ;;  %v3088_v9 = vmov 0  }
 0x1d6   : > { %v1122_v1 = vadd.f32 %v1121_v5, %v2754_v23  ;;  %v1102_v23 = vadd.f32 %v1101_v62, %v2767_v32  ;;  %v1092_v62 = vadd.f32 %v2842_v61, %v2771_v11  ;;  %v2054_v5 = vld [vmem:[#allocation5 + $0x78] ss:$12 sps:$4 sm:$0xff]   ;;  %v1218_v26 = vmax.f32 %v1106_v15, 0.0 }
 0x1d7   : > { %v1125_v30 = vpop.f32.mrf.mxu0  ;;  %v1090_v32 = vadd.f32 %v2840_v58, %v2771_v11  ;;  %v1082_v61 = vadd.f32 %v2833_v12, %v2775_v28  ;;  %v1080_v11 = vadd.f32 %v2831_v0, %v2775_v28  ;;  %v1206_v42 = vmax.f32 %v1076_v16, 0.0  ;;  %v2060_v0 = vld [vmem:[#allocation5 + $0xa8] ss:$12 sps:$4 sm:$0xff]  }
 0x1d8   : > { %v1126_v44 = vadd.f32 %v1125_v30, %v2737_v21  ;;  %v1225_v59 = vmax.f32 %v1122_v1, 0.0  ;;  %v1217_v54 = vmax.f32 %v1102_v23, 0.0  ;;  %v2055_v30 = vld [vmem:[#allocation5 + $0x94] ss:$12 sps:$4 sm:$0xff]   ;;  %v1078_v1 = vadd.f32 %v2827_v47, %v3087_v31 }
 0x1d9   : > { %v1127_v53 = vpop.f32.mrf.mxu0  ;;  %v1212_v58 = vmax.f32 %v1090_v32, 0.0  ;;  %v1209_v12 = vmax.f32 %v1082_v61, 0.0  ;;  %v1281_v61 = vpop.permute.xlu0 %1280 }
 0x1da   : > { %v1128_v2 = vadd.f32 %v1127_v53, %v2737_v21  ;;  %v1226_v13 = vmax.f32 %v1126_v44, 0.0  ;;  %v1108_v21 = vadd.f32 %v1107_v29, %v2759_v38  ;;  %v1275_v18 = vpack.c.bf16 %v1225_v59, %v1223_v7  ;;  %v2061_v59 = vld [vmem:[#allocation5 + $0x8] ss:$12 sps:$4 sm:$0xff]  }
 0x1db   : > { %v1129_v8 = vpop.f32.mrf.mxu0  ;;  %v1096_v38 = vadd.f32 %v2846_v60, %v2765_v37  ;;  %v1272_v53 = vpack.c.bf16 %v1220_v41, %v1218_v26  ;;  %v1086_v37 = vadd.f32 %v2835_v25, %v2769_v3  ;;  %v2058_v25 = vld [vmem:[#allocation5 + $0xac] ss:$12 sps:$4 sm:$0xff]  }
 0x1dc   : > { %v1130_v55 = vadd.f32 %v1129_v8, %v2741_v36  ;;  %1549 = vmatmul.mubr.bf16.gmra.mxu1 %v2048_v34  ;;  %v1227_v46 = vmax.f32 %v1128_v2, 0.0  ;;  %v1219_v29 = vmax.f32 %v1108_v21, 0.0  ;;  %v1215_v34 = vmax.f32 %v1098_v6, 0.0 }
 0x1dd   : > { %v1131_v10 = vpop.f32.mrf.mxu0  ;;  %1558 = vmatprep.mubr.bf16.mxu1 %v2049_v24  ;;  %v1213_v24 = vmax.f32 %v1092_v62, 0.0  ;;  %v1214_v60 = vmax.f32 %v1096_v38, 0.0  ;;  %v1211_v2 = vmax.f32 %v1088_v56, 0.0  ;;  %v1210_v3 = vmax.f32 %v1086_v37, 0.0 }
 0x1de   : > { %v1132_v57 = vadd.f32 %v1131_v10, %v2741_v36  ;;  %v1228_v20 = vmax.f32 %v1130_v55, 0.0  ;;  %v1224_v36 = vmax.f32 %v1120_v14, 0.0  ;;  %v1273_v48 = vpack.c.bf16 %v1221_v33, %v1219_v29  ;;  %v2057_v10 = vld [vmem:[#allocation5 + $0x90] ss:$12 sps:$4 sm:$0xff]  }
 0x1df   : > { %v1271_v8 = vpack.c.bf16 %v1217_v54, %v1215_v34  ;;  %v1270_v55 = vpack.c.bf16 %v1216_v19, %v1214_v60  ;;  %v1269_v44 = vpack.c.bf16 %v1213_v24, %v1211_v2  ;;  %v1208_v14 = vmax.f32 %v1080_v11, 0.0 }
 0x1e0   : > { %v1229_v50 = vmax.f32 %v1132_v57, 0.0  ;;  %v1276_v4 = vpack.c.bf16 %v1228_v20, %v1226_v13  ;;  %v1274_v40 = vpack.c.bf16 %v1224_v36, %v1222_v63  ;;  %v1207_v57 = vmax.f32 %v1078_v1, 0.0  ;;  %v1286_v1 = vpop.permute.xlu1 %1285 }
 0x1e1   : > { %v1268_v47 = vpack.c.bf16 %v1212_v58, %v1210_v3  ;;  %v1266_v28 = vpack.c.bf16 %v1208_v14, %v1206_v42 }
 0x1e2   : > { %v1277_v43 = vpack.c.bf16 %v1229_v50, %v1227_v46  ;;  %v1267_v20 = vpack.c.bf16 %v1209_v12, %v1207_v57  ;;  %v2062_v46 = vld [vmem:[#allocation5 + $0x20] ss:$12 sps:$4 sm:$0xff]   ;;  %v2063_v50 = vld [vmem:[#allocation5 + $0x38] ss:$12 sps:$4 sm:$0xff]  }
 0x1e4   : > { %1559 = vmatmul.mubr.bf16.gmra.mxu1 %v2051_v49  ;;  %1599 = vmatprep.subr.bf16.mxu1 %v1277_v43  ;;  %v2068_v49 = vld [vmem:[#allocation5 + $0xb0] ss:$12 sps:$4 sm:$0xff]  }
 0x1e5   : > { %1600 = vmatpush1.bf16.msra.mxu1 %v1276_v4  ;;  %1568 = vmatprep.mubr.bf16.mxu1 %v2052_v45 }
 0x1e6   : > { %1601 = vmatprep.subr.bf16.mxu1 %v1275_v18 }
 0x1e9   : > { %1602 = vmatpush1.bf16.msra.mxu1 %v1274_v40 }
 0x1ea   : > { %1603 = vmatprep.subr.bf16.mxu1 %v1273_v48 }
 0x1ec   : > { %1569 = vmatmul.mubr.bf16.gmra.mxu1 %v2054_v5 }
 0x1ed   : > { %1604 = vmatpush1.bf16.msra.mxu1 %v1272_v53  ;;  %1578 = vmatprep.mubr.bf16.mxu1 %v2055_v30 }
 0x1ee   : > { %1605 = vmatprep.subr.bf16.mxu1 %v1271_v8 }
 0x1f1   : > { %1606 = vmatpush1.bf16.msra.mxu1 %v1270_v55 }
 0x1f2   : > { %1607 = vmatprep.subr.bf16.mxu1 %v1269_v44 }
 0x1f4   : > { %1579 = vmatmul.mubr.bf16.gmra.mxu1 %v2057_v10  ;;  %v1291_v10 = vpop.permute.xlu0 %1290 }
 0x1f5   : > { %1608 = vmatpush1.bf16.msra.mxu1 %v1268_v47  ;;  %1588 = vmatprep.mubr.bf16.mxu1 %v2058_v25 }
 0x1f6   : > { %1609 = vmatprep.subr.bf16.mxu1 %v1267_v20  ;;  %v1296_v20 = vpop.permute.xlu1 %1295 }
 0x1f9   : > { %1610 = vmatpush1.bf16.msra.mxu1 %v1266_v28 }
 0x1fa   : > { %1611 = vmatprep.subr.bf16.mxu1 %v2829_v22  ;;  %v2064_v22 = vld [vmem:[#allocation5 + $0x50] ss:$12 sps:$4 sm:$0xff]  }
 0x1fc   : > { %1589 = vmatmul.mubr.bf16.gmra.mxu1 %v2060_v0 }
 0x1fd   : > { %1612 = vmatpush1.bf16.msra.mxu1 %v2823_v51  ;;  %1631 = vmatprep.mubr.bf16.mxu1 %v3088_v9  ;;  %v2065_v51 = vld [vmem:[#allocation5 + $0x68] ss:$12 sps:$4 sm:$0xff]  }
 0x1fe   : > { %1613 = vmatprep.subr.bf16.mxu1 %v2805_v27  ;;  %v2067_v27 = vld [vmem:[#allocation5 + $0x98] ss:$12 sps:$4 sm:$0xff]  }
 0x201   : > { %1614 = vmatpush1.bf16.msra.mxu1 %v2799_v35  ;;  %v2066_v35 = vld [vmem:[#allocation5 + $0x80] ss:$12 sps:$4 sm:$0xff]  }
 0x204   : > { %1632 = vmatmul.mubr.bf16.vlgmr.msra.gmra.mxu1 %v2061_v59 }
 0x205   : > { %1641 = vmatprep.mubr.bf16.mxu1 %v3088_v9 }
 0x20c   : > { %1642 = vmatmul.mubr.bf16.gmra.mxu1 %v2062_v46 }
 0x20d   : > { %1651 = vmatprep.mubr.bf16.mxu1 %v3088_v9 }
 0x214   : > { %1652 = vmatmul.mubr.bf16.gmra.mxu1 %v2063_v50  ;;  %v1301_v50 = vpop.permute.xlu0 %1300 }
 0x215   : > { %1661 = vmatprep.mubr.bf16.mxu1 %v3088_v9 }
 0x21c   : > { %1662 = vmatmul.mubr.bf16.gmra.mxu1 %v2064_v22 }
 0x21d   : > { %1671 = vmatprep.mubr.bf16.mxu1 %v3088_v9 }
 0x224   : > { %1672 = vmatmul.mubr.bf16.gmra.mxu1 %v2065_v51 }
 0x225   : > { %1681 = vmatprep.mubr.bf16.mxu1 %v3088_v9 }
 0x22c   : > { %1682 = vmatmul.mubr.bf16.gmra.mxu1 %v2066_v35 }
 0x22d   : > { %1691 = vmatprep.mubr.bf16.mxu1 %v3088_v9 }
 0x234   : > { %1692 = vmatmul.mubr.bf16.gmra.mxu1 %v2067_v27 }
 0x235   : > { %1701 = vmatprep.mubr.bf16.mxu1 %v3088_v9 }
 0x23c   : > { %1702 = vmatmul.mubr.bf16.gmra.mxu1 %v2068_v49 }
 0x284   : > { %v1520_v52 = vpop.f32.mrf.mxu1 }
 0x285   : > { %v1521_v8 = vadd.f32 %v1520_v52, %v1281_v61 }
 0x286   : > { %v1522_v13 = vpop.f32.mrf.mxu1 }
 0x287   : > { %v1523_v60 = vadd.f32 %v1522_v13, %v1281_v61  ;;  %v1306_v13 = vpop.permute.xlu1 %1305 }
 0x288   : > { %v1524_v45 = vpop.f32.mrf.mxu1 }
 0x289   : > { %v1525_v11 = vadd.f32 %v1524_v45, %v1286_v1 }
 0x28a   : > { %v1526_v21 = vpop.f32.mrf.mxu1 }
 0x28b   : > { %v1527_v12 = vadd.f32 %v1526_v21, %v1286_v1 }
 0x28c   : > { %v1530_v7 = vpop.f32.mrf.mxu1 }
 0x28d   : > { %v1531_v3 = vadd.f32 %v1530_v7, %v1291_v10 }
 0x28e   : > { %v1532_v43 = vpop.f32.mrf.mxu1 }
 0x28f   : > { %v1533_v14 = vadd.f32 %v1532_v43, %v1291_v10 }
 0x290   : > { %v1534_v39 = vpop.f32.mrf.mxu1 }
 0x291   : > { %v1535_v28 = vadd.f32 %v1534_v39, %v1296_v20 }
 0x292   : > { %v1536_v36 = vpop.f32.mrf.mxu1 }
 0x293   : > { %v1537_v59 = vadd.f32 %v1536_v36, %v1296_v20 }
 0x294   : > { %v1540_v4 = vpop.f32.mrf.mxu1 }
 0x295   : > { %v1541_v51 = vadd.f32 %v1540_v4, %v1301_v50  ;;  %v1311_v4 = vpop.permute.xlu0 %1310 }
 0x296   : > { %v2894_v23 = vpop.f32.mrf.mxu1 }
 0x297   : > { %v1543_v49 = vadd.f32 %v2894_v23, %v1301_v50 }
 0x298   : > { %v2896_v33 = vpop.f32.mrf.mxu1 }
 0x299   : > { %v1545_v21 = vadd.f32 %v2896_v33, %v1306_v13 }
 0x29a   : > { %v2898_v18 = vpop.f32.mrf.mxu1 }
 0x29b   : > { %v1547_v39 = vadd.f32 %v2898_v18, %v1306_v13 }
 0x29c   : > { %v2900_v15 = vpop.f32.mrf.mxu1 }
 0x29d   : > { %v1551_v23 = vadd.f32 %v2900_v15, %v1311_v4 }
 0x29e   : > { %v2902_v63 = vpop.f32.mrf.mxu1 }
 0x2a0   : > { %v2904_v6 = vpop.f32.mrf.mxu1 }
 0x2a2   : > { %v2906_v29 = vpop.f32.mrf.mxu1 }
 0x2a4   : > { %v2908_v17 = vpop.f32.mrf.mxu1 }
 0x2a6   : > { %v2910_v41 = vpop.f32.mrf.mxu1 }
 0x2a8   : > { %v2912_v40 = vpop.f32.mrf.mxu1 }
 0x2aa   : > { %v2914_v62 = vpop.f32.mrf.mxu1 }
 0x2ac   : > { %v2916_v54 = vpop.f32.mrf.mxu1 }
 0x2ae   : > { %v2918_v48 = vpop.f32.mrf.mxu1 }
 0x2b0   : > { %v2920_v5 = vpop.f32.mrf.mxu1 }
 0x2b2   : > { %v2922_v38 = vpop.f32.mrf.mxu1 }
 0x2b4   : > { %v2924_v26 = vpop.f32.mrf.mxu1 }
 0x2b6   : > { %v2926_v30 = vpop.f32.mrf.mxu1 }
 0x2b8   : > { %v2928_v56 = vpop.f32.mrf.mxu1 }
 0x2ba   : > { %v2930_v34 = vpop.f32.mrf.mxu1 }
 0x2bc   : > { %v2932_v32 = vpop.f32.mrf.mxu1 }
 0x2be   : > { %v2934_v19 = vpop.f32.mrf.mxu1 }
 0x2c0   : > { %v2937_v53 = vpop.f32.mrf.mxu1 }
 0x2c2   : > { %v2941_v24 = vpop.f32.mrf.mxu1 }
 0x2c4   : > { %v1633_v37 = vpop.f32.mrf.mxu1 }
 0x2c5   : > { %v1634_v31 = vadd.f32 %v1633_v37, %v1521_v8 }
 0x2c6   : > { %v1635_v2 = vpop.f32.mrf.mxu1 }
 0x2c7   : > { %1712 = vst [vmem:[%s2943_s7] sm:$0xff] %v1634_v31  ;;  %v1636_v58 = vadd.f32 %v1635_v2, %v1523_v60  ;;  %v1553_v60 = vadd.f32 %v2902_v63, %v1311_v4  ;;  %v1316_v31 = vpop.permute.xlu1 %1315 }
 0x2c8   : > { %v1637_v55 = vpop.f32.mrf.mxu1  ;;  %v1555_v18 = vadd.f32 %v2904_v6, %v1316_v31 }
 0x2c9   : > { %1713 = vst [vmem:[%s2943_s7 + $0x8] sm:$0xff] %v1636_v58  ;;  %v1638_v44 = vadd.f32 %v1637_v55, %v1525_v11  ;;  %v1557_v58 = vadd.f32 %v2906_v29, %v1316_v31  ;;  %v1321_v55 = vpop.permute.xlu0 %1320 }
 0x2ca   : > { %v1639_v16 = vpop.f32.mrf.mxu1  ;;  %v1561_v63 = vadd.f32 %v2908_v17, %v1321_v55 }
 0x2cb   : > { %1714 = vst [vmem:[%s2943_s7 + $0x10] sm:$0xff] %v1638_v44  ;;  %v1640_v25 = vadd.f32 %v1639_v16, %v1527_v12  ;;  %v1563_v16 = vadd.f32 %v2910_v41, %v1321_v55 }
 0x2cc   : > { %v1643_v57 = vpop.f32.mrf.mxu1 }
 0x2cd   : > { %1715 = vst [vmem:[%s2943_s7 + $0x18] sm:$0xff] %v1640_v25  ;;  %v1644_v47 = vadd.f32 %v1643_v57, %v1531_v3  ;;  %v1326_v3 = vpop.permute.xlu1 %1325  ;;  %v1331_v20 = vpop.permute.xlu0 %1330 }
 0x2ce   : > { %v1645_v42 = vpop.f32.mrf.mxu1  ;;  %v1565_v29 = vadd.f32 %v2912_v40, %v1326_v3  ;;  %v1571_v41 = vadd.f32 %v2916_v54, %v1331_v20 }
 0x2cf   : > { %1716 = vst [vmem:[%s2943_s7 + $0x20] sm:$0xff] %v1644_v47  ;;  %v1646_v0 = vadd.f32 %v1645_v42, %v1533_v14  ;;  %v1567_v47 = vadd.f32 %v2914_v62, %v1326_v3 }
 0x2d0   : > { %v1647_v9 = vpop.f32.mrf.mxu1 }
 0x2d1   : > { %1717 = vst [vmem:[%s2943_s7 + $0x28] sm:$0xff] %v1646_v0  ;;  %v1648_v46 = vadd.f32 %v1647_v9, %v1535_v28  ;;  %v1573_v9 = vadd.f32 %v2918_v48, %v1331_v20 }
 0x2d2   : > { %v1649_v22 = vpop.f32.mrf.mxu1 }
 0x2d3   : > { %1718 = vst [vmem:[%s2943_s7 + $0x30] sm:$0xff] %v1648_v46  ;;  %v1650_v35 = vadd.f32 %v1649_v22, %v1537_v59  ;;  %v1336_v59 = vpop.permute.xlu1 %1335 }
 0x2d4   : > { %v1653_v27 = vpop.f32.mrf.mxu1  ;;  %v1575_v62 = vadd.f32 %v2920_v5, %v1336_v59 }
 0x2d5   : > { %1719 = vst [vmem:[%s2943_s7 + $0x38] sm:$0xff] %v1650_v35  ;;  %v1654_v52 = vadd.f32 %v1653_v27, %v1541_v51  ;;  %v1577_v51 = vadd.f32 %v2922_v38, %v1336_v59  ;;  %v1341_v35 = vpop.permute.xlu0 %1340 }
 0x2d6   : > { %v1655_v45 = vpop.f32.mrf.mxu1  ;;  %v1581_v48 = vadd.f32 %v2924_v26, %v1341_v35  ;;  %v1583_v13 = vadd.f32 %v2926_v30, %v1341_v35 }
 0x2d7   : > { %1720 = vst [vmem:[%s2943_s7 + $0x40] sm:$0xff] %v1654_v52  ;;  %v1656_v7 = vadd.f32 %v1655_v45, %v1543_v49  ;;  %v1346_v45 = vpop.permute.xlu1 %1345 }
 0x2d8   : > { %v1657_v43 = vpop.f32.mrf.mxu1  ;;  %v1585_v38 = vadd.f32 %v2928_v56, %v1346_v45 }
 0x2d9   : > { %1721 = vst [vmem:[%s2943_s7 + $0x48] sm:$0xff] %v1656_v7  ;;  %v1658_v36 = vadd.f32 %v1657_v43, %v1545_v21 }
 0x2da   : > { %v1659_v61 = vpop.f32.mrf.mxu1 }
 0x2db   : > { %1722 = vst [vmem:[%s2943_s7 + $0x50] sm:$0xff] %v1658_v36  ;;  %v1660_v8 = vadd.f32 %v1659_v61, %v1547_v39  ;;  %v1587_v39 = vadd.f32 %v2930_v34, %v1346_v45  ;;  %v1351_v36 = vpop.permute.xlu0 %1350 }
 0x2dc   : > { %v1663_v37 = vpop.f32.mrf.mxu1  ;;  %v1591_v30 = vadd.f32 %v2932_v32, %v1351_v36  ;;  %v1593_v56 = vadd.f32 %v2934_v19, %v1351_v36 }
 0x2dd   : > { %1723 = vst [vmem:[%s2943_s7 + $0x58] sm:$0xff] %v1660_v8  ;;  %v1664_v33 = vadd.f32 %v1663_v37, %v1551_v23  ;;  %v1356_v37 = vpop.permute.xlu1 %1355 }
 0x2de   : > { %v1665_v1 = vpop.f32.mrf.mxu1  ;;  %v1597_v31 = vadd.f32 %v2941_v24, %v1356_v37 }
 0x2df   : > { %1724 = vst [vmem:[%s2943_s7 + $0x60] sm:$0xff] %v1664_v33  ;;  %v1666_v2 = vadd.f32 %v1665_v1, %v1553_v60  ;;  %v1595_v60 = vadd.f32 %v2937_v53, %v1356_v37 }
 0x2e0   : > { %v1667_v11 = vpop.f32.mrf.mxu1 }
 0x2e1   : > { %1725 = vst [vmem:[%s2943_s7 + $0x68] sm:$0xff] %v1666_v2  ;;  %v1668_v15 = vadd.f32 %v1667_v11, %v1555_v18 }
 0x2e2   : > { %v1669_v12 = vpop.f32.mrf.mxu1 }
 0x2e3   : > { %1726 = vst [vmem:[%s2943_s7 + $0x70] sm:$0xff] %v1668_v15  ;;  %v1670_v44 = vadd.f32 %v1669_v12, %v1557_v58 }
 0x2e4   : > { %v1673_v10 = vpop.f32.mrf.mxu1 }
 0x2e5   : > { %1727 = vst [vmem:[%s2943_s7 + $0x78] sm:$0xff] %v1670_v44  ;;  %v1674_v6 = vadd.f32 %v1673_v10, %v1561_v63 }
 0x2e6   : > { %v1675_v25 = vpop.f32.mrf.mxu1 }
 0x2e7   : > { %1728 = vst [vmem:[%s2943_s7 + $0x80] sm:$0xff] %v1674_v6  ;;  %v1676_v57 = vadd.f32 %v1675_v25, %v1563_v16 }
 0x2e8   : > { %v1677_v14 = vpop.f32.mrf.mxu1 }
 0x2e9   : > { %1729 = vst [vmem:[%s2943_s7 + $0x88] sm:$0xff] %v1676_v57  ;;  %v1678_v17 = vadd.f32 %v1677_v14, %v1565_v29 }
 0x2ea   : > { %v1679_v42 = vpop.f32.mrf.mxu1 }
 0x2eb   : > { %1730 = vst [vmem:[%s2943_s7 + $0x90] sm:$0xff] %v1678_v17  ;;  %v1680_v28 = vadd.f32 %v1679_v42, %v1567_v47 }
 0x2ec   : > { %v1683_v0 = vpop.f32.mrf.mxu1 }
 0x2ed   : > { %1731 = vst [vmem:[%s2943_s7 + $0x98] sm:$0xff] %v1680_v28  ;;  %v1684_v40 = vadd.f32 %v1683_v0, %v1571_v41 }
 0x2ee   : > { %v1685_v46 = vpop.f32.mrf.mxu1 }
 0x2ef   : > { %1732 = vst [vmem:[%s2943_s7 + $0xa0] sm:$0xff] %v1684_v40  ;;  %v1686_v50 = vadd.f32 %v1685_v46, %v1573_v9 }
 0x2f0   : > { %v1687_v22 = vpop.f32.mrf.mxu1 }
 0x2f1   : > { %1733 = vst [vmem:[%s2943_s7 + $0xa8] sm:$0xff] %v1686_v50  ;;  %v1688_v54 = vadd.f32 %v1687_v22, %v1575_v62 }
 0x2f2   : > { %v1689_v27 = vpop.f32.mrf.mxu1 }
 0x2f3   : > { %1734 = vst [vmem:[%s2943_s7 + $0xb0] sm:$0xff] %v1688_v54  ;;  %v1690_v49 = vadd.f32 %v1689_v27, %v1577_v51 }
 0x2f4   : > { %v1693_v52 = vpop.f32.mrf.mxu1 }
 0x2f5   : > { %1735 = vst [vmem:[%s2943_s7 + $0xb8] sm:$0xff] %v1690_v49  ;;  %v1694_v5 = vadd.f32 %v1693_v52, %v1581_v48 }
 0x2f6   : > { %v1695_v21 = vpop.f32.mrf.mxu1 }
 0x2f7   : > { %1736 = vst [vmem:[%s2943_s7 + $0xc0] sm:$0xff] %v1694_v5  ;;  %v1696_v7 = vadd.f32 %v1695_v21, %v1583_v13 }
 0x2f8   : > { %v1697_v43 = vpop.f32.mrf.mxu1 }
 0x2f9   : > { %1737 = vst [vmem:[%s2943_s7 + $0xc8] sm:$0xff] %v1696_v7  ;;  %v1698_v26 = vadd.f32 %v1697_v43, %v1585_v38 }
 0x2fa   : > { %v1699_v4 = vpop.f32.mrf.mxu1 }
 0x2fb   : > { %1738 = vst [vmem:[%s2943_s7 + $0xd0] sm:$0xff] %v1698_v26  ;;  %v1700_v61 = vadd.f32 %v1699_v4, %v1587_v39 }
 0x2fc   : > { %v1703_v23 = vpop.f32.mrf.mxu1 }
 0x2fd   : > { %1739 = vst [vmem:[%s2943_s7 + $0xd8] sm:$0xff] %v1700_v61  ;;  %v1704_v8 = vadd.f32 %v1703_v23, %v1591_v30 }
 0x2fe   : > { %v1705_v34 = vpop.f32.mrf.mxu1 }
 0x2ff   : > { %1740 = vst [vmem:[%s2943_s7 + $0xe0] sm:$0xff] %v1704_v8  ;;  %v1706_v33 = vadd.f32 %v1705_v34, %v1593_v56 }
 0x300   : > { %v1707_v32 = vpop.f32.mrf.mxu1 }
 0x301   : > { %1741 = vst [vmem:[%s2943_s7 + $0xe8] sm:$0xff] %v1706_v33  ;;  %v1708_v1 = vadd.f32 %v1707_v32, %v1595_v60 }
 0x302   : > { %v1709_v19 = vpop.f32.mrf.mxu1 }
 0x303   : > { %1742 = vst [vmem:[%s2943_s7 + $0xf0] sm:$0xff] %v1708_v1  ;;  %v1710_v53 = vadd.f32 %v1709_v19, %v1597_v31 }
 0x305   : > { %1743 = vst [vmem:[%s2943_s7 + $0xf8] sm:$0xff] %v1710_v53 }
 0x306   : > { %2134 = shalt.err (!%p2131_p9)
}
 0x307   : > { %s2135_s25 = scalar_lea.hbm %s3003_s15, 4096  ;;  %s2139_s9 = scalar_lea.hbm %s3061_s5, 8192 }
 0x308   : > { %p2136_p12 = scmp.ne.s32.totalorder %s3003_s15, %s2135_s25  ;;  %p2140_p5 = scmp.lt.s32.totalorder %s3003_s15, %s3061_s5 }
 0x309   : > { %p2141_p3 = scmp.lt.s32.totalorder %s2139_s9, %s2135_s25 }
 0x30a   : > { %p2137_p1 = pnand %p2136_p12, %p3089_p10 }
 0x30b   : > { %p2142_p4 = por %p2141_p3, %p2140_p5 }
 0x30c   : > { %p2138_p2 = pneg %p2137_p1 }
 0x30e   : > { %p2143_p8 = pnand %p2142_p4, %p2138_p2 }
 0x310   : > { %2146 = shalt.err (!%p2143_p8)
}
 0x311   : > { %s2215_s10 = smov 256   ;;  %s2216_s13 = smov 16  }
 0x312   : > { %1936 = dma.vmem_to_hbm [thread:$0]  (%p3089_p10), %s3005_s11, 4096, %s3003_s15, %s3011_s21, %s2215_s10, %s2215_s10, %s2216_s13  }
 0x313 PF: > { %p1953_p11 = scmp.ge.s32.totalorder %s2205_s23, 2  ;;  %s1775_s8 = sand.u32 1, %s2185_s18  }
 0x314   : > { %p3090_p13 = scmp.ne.s32.totalorder %s3072_s30, 0  ;;  %s1776_s16 = scalar_lea.sflag [#allocation4], %s1775_s8 }
 0x316   : > { %p1946_p0 = pnand %p1953_p11, %p3090_p13 }
 0x318   : > { %p1947_p6 = pneg %p1946_p0 }
 0x31a   : > { %2180 = dma.done.wait (%p1947_p6), %s1776_s16, 4096  }
 0x31b   : > { %2182 = vsyncadd (%p1947_p6), %s1776_s16, 4294963200  ;;  %s20_s23 = sadd.s32 1, %s2205_s23   ;;  %s3091_s18 = smov %s2189_s19 }
 0x31c   : > { %p17_p7 = scmp.ge.s32.totalorder %s20_s23, 4   ;;  %s3092_s19 = smov %s2193_s20 }
 0x31d   : > { %s3093_s20 = smov %s2300_s6  ;;  %s3094_s21 = smov %s2201_s22 }
 0x31e   : > { %s3095_s22 = smov %s3097_s26  ;;  %19 = sbr.rel (!%p17_p7) target bundleno = 6 (0x6), region = 84 }
 0x323   :  { %1781 = vsyncpa [#allocation3], 1 }
 0x324   :  { %1783 = vsyncpa [#allocation3 + $0x1], 1 }
 0x325   :  { %1784 = vsyncpa [#allocation6], 1 }
 0x326   :  { %1785 = vsyncpa [#allocation4], 1 }
 0x327   :  { %1787 = vsyncpa [#allocation4 + $0x1], 1 }

</bundles_post_ra>
